<compile_context>
chip_gen: v7x
topology: tpu7x:2x2x1
jax: 0.10.0
libtpu: 0.0.40
codegen_flags: <defaults>
</compile_context>

<pallas_src>
import functools

import jax
import jax.numpy as jnp
from jax import image as jax_image
from jax.experimental import pallas as pl
from jax.experimental.pallas import tpu as pltpu


def _fusion_kernel(x_ref, xt_ref, xb_ref, g_ref, gt_ref, gb_ref,
                   w1_ref, b1_ref, wd_ref, bd_ref, o_ref, *, use_mxu):
    # x_ref : (1, TH, C, W)   current row-slab of x
    # xt_ref: (1, 1,  C, W)   row (i*TH - 1), clamped; masked at the top border
    # xb_ref: (1, 1,  C, W)   row (i*TH + TH), clamped; masked at bottom border
    # g_ref : (1, TH, Cg, W)  gt_ref / gb_ref: (1, 1, Cg, W)
    # w1_ref: (C, Cg) if use_mxu else (Cg, C, 1)
    # b1_ref: (C, 1)  wd_ref: (3, 3, C, 1)  bd_ref: (C, 1)
    # o_ref : (1, TH, C, W)
    i = pl.program_id(1)
    nrt = pl.num_programs(1)
    _, TH, C, W = x_ref.shape
    Cg = g_ref.shape[2]
    f32 = jnp.float32

    b1_v = b1_ref[...]                                        # (C, 1)
    bd_v = bd_ref[...]                                        # (C, 1)
    wd_taps = [[wd_ref[dy, dx] for dx in range(3)] for dy in range(3)]

    # ---- 1x1 conv over the haloed slab: g_full (TH+2, Cg, W) -> g1 (TH+2, C, W)
    g_full = jnp.concatenate([gt_ref[0], g_ref[0], gb_ref[0]], axis=0)
    R = TH + 2
    if use_mxu:
        # (C, Cg) x (Cg, W) per row on the MXU, f32 accumulate.  The weight
        # tile is reused across rows, so vreg pressure stays bounded.
        # TODO(synk): keep operands in bf16 when the caller supplies bf16
        # activations for extra MXU throughput (small accuracy cost).
        w1t = w1_ref[...].astype(f32)                         # (C, Cg)
        rows = [jnp.dot(w1t, g_full[r].astype(f32), preferred_element_type=f32)
                for r in range(R)]                            # each (C, W)
        g1_full = jnp.stack(rows, axis=0) + b1_v              # (R, C, W)
    else:
        # Tiny-Cg path: per-input-channel broadcast-MACs on the VPU (an MXU
        # pass would be mostly padding).  Cg < 16 here, so hoisting every
        # weight row keeps well under the 64-vreg budget.
        w1_rows = [w1_ref[k] for k in range(Cg)]              # each (C, 1)
        acc1 = g_full[:, 0:1, :].astype(f32) * w1_rows[0]
        for k in range(1, Cg):
            acc1 = acc1 + g_full[:, k:k + 1, :].astype(f32) * w1_rows[k]
        g1_full = acc1 + b1_v                                 # (R, C, W)

    # ---- t = x + g1; out-of-image halo rows zeroed (conv zero padding).
    valid_top = (i > 0).astype(f32)
    valid_bot = (i < nrt - 1).astype(f32)
    t_top = (xt_ref[0].astype(f32) + g1_full[0:1]) * valid_top
    t_cur = x_ref[0].astype(f32) + g1_full[1:TH + 1]
    t_bot = (xb_ref[0].astype(f32) + g1_full[TH + 1:TH + 2]) * valid_bot
    t = jnp.concatenate([t_top, t_cur, t_bot], axis=0)        # (R, C, W)

    # ---- Depthwise 3x3 conv, padding=1.
    # dx taps come from two hoisted shifted copies of t (not 6 per-tap copies).
    if W % 128 == 0:
        lane = jax.lax.broadcasted_iota(jnp.int32, (1, 1, W), 2)
        t_m1 = pltpu.roll(t, shift=1, axis=2) * (lane > 0).astype(f32)
        t_p1 = pltpu.roll(t, shift=W - 1, axis=2) * (lane < W - 1).astype(f32)
    else:
        # Lane-sparse fallback (toy shapes): shift via slice + zero column.
        zcol = jnp.zeros((R, C, 1), f32)
        t_m1 = jnp.concatenate([zcol, t[:, :, :W - 1]], axis=2)
        t_p1 = jnp.concatenate([t[:, :, 1:], zcol], axis=2)

    acc = None
    for dy in range(3):
        term = (t_m1[dy:dy + TH] * wd_taps[dy][0]
                + t[dy:dy + TH] * wd_taps[dy][1]
                + t_p1[dy:dy + TH] * wd_taps[dy][2])
        acc = term if acc is None else acc + term

    # Exact sigmoid (kept for parity with the reference; the EUP
    # exp + pl.reciprocal(approx=True) variant is only a few-% VALU saving).
    gate = jax.nn.sigmoid(acc + bd_v)
    o_ref[0] = (x_ref[0].astype(f32) + gate).astype(o_ref.dtype)


def _select_tiling(N, H, C, Cg, W, x_itemsize, g_itemsize, tile_h):
    """VMEM-aware tile-height + scoped-VMEM-limit selection."""
    try:
        vmem_cap = int(pltpu.get_tpu_info().vmem_capacity_bytes) or (128 << 20)
    except Exception:
        vmem_cap = 128 << 20
    budget = min(int(0.6 * vmem_cap), 96 << 20)
    # v7x has 64 MiB VMEM per TensorCore -> cap slabs lower than v5e/v6e.
    th_cap = 32 if vmem_cap <= (64 << 20) else 64

    def est_bytes(th):
        # Double-buffered pipeline buffers: x/g slabs + 2 one-row halos each,
        # plus the output slab.
        io = 2 * ((th + 2) * C * W * x_itemsize
                  + (th + 2) * Cg * W * g_itemsize
                  + th * C * W * x_itemsize)
        # ~6 live f32 (th+2, C, W) kernel temporaries (g1, t, two shifted
        # copies, depthwise accumulator, gate) + the (th+2, Cg, W) g concat.
        tmp = (6 * (th + 2) * C * W + (th + 2) * Cg * W) * 4
        return io + tmp

    if tile_h is not None:
        if H % tile_h != 0:
            raise ValueError(f"tile_h={tile_h} must divide H={H}")
        th = tile_h
    else:
        cands = [t for t in range(min(H, th_cap), 0, -1) if H % t == 0]
        th = next((t for t in cands if est_bytes(t) <= budget), cands[-1])
        # Keep the grid >= 2 steps (pipelining) and even (2-TC megacore parts).
        total = N * (H // th)
        if (total == 1 or (total % 2 == 1 and total <= 8)) and th % 2 == 0 and th >= 8:
            th //= 2

    vmem_limit = int(min(0.75 * vmem_cap,
                         max(32 << 20, 1.5 * est_bytes(th))))
    return th, vmem_limit


def guidance_fusion_block(x, g, params, *, tile_h=None, mxu_min_cg=16):
    """Fused GuidanceFusionBlock forward.

    x: (N, H, C, W)  — PyTorch NCHW with H and C swapped (pure transpose).
    g: (N, Hg, Cg, Wg).
    params:
      w1: (Cg, C)    == torch g_conv1.weight[c, k, 0, 0] transposed
      b1: (C,)       == torch g_conv1.bias
      wd: (3, 3, C)  == torch depthwise weight[c, 0, dy, dx]
      bd: (C,)       == torch depthwise bias
    Returns (N, H, C, W) in x.dtype.  x/g/output may be bf16 (compute is f32).
    """
    w1, b1, wd, bd = params["w1"], params["b1"], params["wd"], params["bd"]
    N, H, C, W = x.shape
    Cg = g.shape[2]

    if g.shape[1] != H or g.shape[3] != W:
        # F.interpolate(mode='bilinear', align_corners=False) equivalent; the
        # 1x1 conv commutes exactly with the per-channel bilinear resize, so
        # resizing g before the fused kernel preserves the module semantics.
        # TODO(synk): fuse the upsample into the kernel (scalar-prefetch source
        # row indices/weights) so full-resolution g is never written to and
        # re-read from HBM; jax.image.resize also antialiases on downsampling,
        # unlike PyTorch's bilinear interpolate.
        g = jax_image.resize(g, (N, H, Cg, W), method="bilinear")

    TH, vmem_limit = _select_tiling(
        N, H, C, Cg, W,
        jnp.dtype(x.dtype).itemsize, jnp.dtype(g.dtype).itemsize, tile_h)
    n_row_tiles = H // TH

    use_mxu = Cg >= mxu_min_cg
    if use_mxu:
        w1_arg = jnp.asarray(w1, jnp.float32).T                      # (C, Cg)
        w1_spec = pl.BlockSpec((C, Cg), lambda n, i: (0, 0))
    else:
        w1_arg = jnp.asarray(w1, jnp.float32).reshape(Cg, C, 1)
        w1_spec = pl.BlockSpec((Cg, C, 1), lambda n, i: (0, 0, 0))
    b1r = jnp.asarray(b1, jnp.float32).reshape(C, 1)
    wdr = jnp.asarray(wd, jnp.float32).reshape(3, 3, C, 1)
    bdr = jnp.asarray(bd, jnp.float32).reshape(C, 1)

    main_map = lambda n, i: (n, i, 0, 0)
    row_top = lambda n, i: (n, jnp.maximum(i * TH - 1, 0), 0, 0)
    row_bot = lambda n, i: (n, jnp.minimum(i * TH + TH, H - 1), 0, 0)

    kernel = functools.partial(_fusion_kernel, use_mxu=use_mxu)
    return pl.pallas_call(
        kernel,
        out_shape=jax.ShapeDtypeStruct((N, H, C, W), x.dtype),
        grid=(N, n_row_tiles),
        in_specs=[
            pl.BlockSpec((1, TH, C, W), main_map),    # x slab
            pl.BlockSpec((1, 1, C, W), row_top),      # x top halo row
            pl.BlockSpec((1, 1, C, W), row_bot),      # x bottom halo row
            pl.BlockSpec((1, TH, Cg, W), main_map),   # g slab
            pl.BlockSpec((1, 1, Cg, W), row_top),     # g top halo row
            pl.BlockSpec((1, 1, Cg, W), row_bot),     # g bottom halo row
            w1_spec,
            pl.BlockSpec((C, 1), lambda n, i: (0, 0)),
            pl.BlockSpec((3, 3, C, 1), lambda n, i: (0, 0, 0, 0)),
            pl.BlockSpec((C, 1), lambda n, i: (0, 0)),
        ],
        out_specs=pl.BlockSpec((1, TH, C, W), main_map),
        compiler_params=pltpu.CompilerParams(
            dimension_semantics=("parallel", "parallel"),
            vmem_limit_bytes=vmem_limit,
        ),
    )(x, x, x, g, g, g, w1_arg, b1r, wdr, bdr)


def reference(x, g, params):
    """Pure-JAX reference with the same semantics as the PyTorch module."""
    w1, b1, wd, bd = params["w1"], params["b1"], params["wd"], params["bd"]
    N, H, C, W = x.shape
    hi = jax.lax.Precision.HIGHEST
    x_nchw = jnp.transpose(x, (0, 2, 1, 3))
    g_nchw = jnp.transpose(g, (0, 2, 1, 3))
    g1 = jnp.einsum("nkhw,kc->nchw", g_nchw, w1,
                    precision=hi) + b1[None, :, None, None]
    if g1.shape[2:] != (H, W):
        g1 = jax_image.resize(g1, (N, C, H, W), method="bilinear")
    t = x_nchw + g1
    dw = jnp.transpose(wd, (2, 0, 1))[:, None, :, :]          # (C, 1, 3, 3)
    conv = jax.lax.conv_general_dilated(
        t, dw, window_strides=(1, 1), padding="SAME",
        dimension_numbers=("NCHW", "OIHW", "NCHW"),
        feature_group_count=C, precision=hi)
    out = jax.nn.sigmoid(conv + bd[None, :, None, None])
    y = x_nchw + out
    return jnp.transpose(y, (0, 2, 1, 3))


if __name__ == "__main__":
    # ---- Test 1: tiny shapes, VPU 1x1-conv path, interior + border halo rows.
    N, H, W, Cg, C = 2, 16, 16, 4, 8
    kx, kg, k1, k2, k3, k4 = jax.random.split(jax.random.PRNGKey(0), 6)
    x = jax.random.normal(kx, (N, H, C, W), jnp.float32)       # (N, H, C, W)
    g = jax.random.normal(kg, (N, H, Cg, W), jnp.float32)
    params = {
        "w1": 0.2 * jax.random.normal(k1, (Cg, C), jnp.float32),
        "b1": 0.1 * jax.random.normal(k2, (C,), jnp.float32),
        "wd": 0.2 * jax.random.normal(k3, (3, 3, C), jnp.float32),
        "bd": 0.1 * jax.random.normal(k4, (C,), jnp.float32),
    }
    # tile_h=8 -> two row tiles per image, exercising the halo / border path.
    y = jax.block_until_ready(guidance_fusion_block(x, g, params, tile_h=8))
    y_ref = jax.block_until_ready(reference(x, g, params))
    assert y.shape == (N, H, C, W)
    assert jnp.allclose(y, y_ref, atol=1e-4, rtol=1e-4), "test1 mismatch"

    # ---- Test 2: MXU 1x1-conv path (Cg>=16), lane-roll dx shifts (W=128),
    #              bilinear-upsampled guidance, auto tile/VMEM selection.
    N2, H2, W2, Cg2, C2 = 1, 8, 128, 32, 16
    kx2, kg2, k5, k6, k7, k8 = jax.random.split(jax.random.PRNGKey(1), 6)
    x2 = jax.random.normal(kx2, (N2, H2, C2, W2), jnp.float32)
    g2 = jax.random.normal(kg2, (N2, H2 // 2, Cg2, W2 // 2), jnp.float32)
    params2 = {
        "w1": 0.2 * jax.random.normal(k5, (Cg2, C2), jnp.float32),
        "b1": 0.1 * jax.random.normal(k6, (C2,), jnp.float32),
        "wd": 0.2 * jax.random.normal(k7, (3, 3, C2), jnp.float32),
        "bd": 0.1 * jax.random.normal(k8, (C2,), jnp.float32),
    }
    y2 = jax.block_until_ready(guidance_fusion_block(x2, g2, params2))
    y2_ref = jax.block_until_ready(reference(x2, g2, params2))
    assert y2.shape == (N2, H2, C2, W2)
    # The in-kernel MXU dot may use reduced-precision bf16 passes vs the
    # HIGHEST-precision XLA reference, hence the looser tolerance here.
    assert jnp.allclose(y2, y2_ref, atol=5e-3, rtol=5e-3), "test2 mismatch"

    print("KERNEL_OK")
</pallas_src>

<mosaic_0001>
module attributes {stable_mosaic.version = 11 : i64} {
  func.func @_fusion_kernel(%arg0: i32, %arg1: i32, %arg2: memref<1x8x8x16xf32, #tpu.memory_space<vmem>>, %arg3: memref<1x1x8x16xf32, #tpu.memory_space<vmem>>, %arg4: memref<1x1x8x16xf32, #tpu.memory_space<vmem>>, %arg5: memref<1x8x4x16xf32, #tpu.memory_space<vmem>>, %arg6: memref<1x1x4x16xf32, #tpu.memory_space<vmem>>, %arg7: memref<1x1x4x16xf32, #tpu.memory_space<vmem>>, %arg8: memref<4x8x1xf32, #tpu.memory_space<vmem>>, %arg9: memref<8x1xf32, #tpu.memory_space<vmem>>, %arg10: memref<3x3x8x1xf32, #tpu.memory_space<vmem>>, %arg11: memref<8x1xf32, #tpu.memory_space<vmem>>, %arg12: memref<1x8x8x16xf32, #tpu.memory_space<vmem>>) attributes {dimension_semantics = [#tpu.dimension_semantics<parallel>, #tpu.dimension_semantics<parallel>], iteration_bounds = array<i64: 2, 2>, scalar_prefetch = 0 : i64, scratch_operands = 0 : i64, tpu.core_type = #tpu.core_type<tc>, window_params = [{transform_indices = @transform_0, window_bounds = array<i64: 1, 8, 8, 16>}, {transform_indices = @transform_1, window_bounds = array<i64: 1, 1, 8, 16>}, {transform_indices = @transform_2, window_bounds = array<i64: 1, 1, 8, 16>}, {transform_indices = @transform_3, window_bounds = array<i64: 1, 8, 4, 16>}, {transform_indices = @transform_4, window_bounds = array<i64: 1, 1, 4, 16>}, {transform_indices = @transform_5, window_bounds = array<i64: 1, 1, 4, 16>}, {pipeline_mode = #tpu.pipeline_mode<synchronous>, transform_indices = @transform_6, window_bounds = array<i64: 4, 8, 1>}, {pipeline_mode = #tpu.pipeline_mode<synchronous>, transform_indices = @transform_7, window_bounds = array<i64: 8, 1>}, {pipeline_mode = #tpu.pipeline_mode<synchronous>, transform_indices = @transform_8, window_bounds = array<i64: 3, 3, 8, 1>}, {pipeline_mode = #tpu.pipeline_mode<synchronous>, transform_indices = @transform_9, window_bounds = array<i64: 8, 1>}, {transform_indices = @transform_10, window_bounds = array<i64: 1, 8, 8, 16>}]} {
    %c0 = arith.constant 0 : index
    %c0_0 = arith.constant 0 : index
    %0 = vector.load %arg9[%c0, %c0_0] : memref<8x1xf32, #tpu.memory_space<vmem>>, vector<8x1xf32>
    %c0_1 = arith.constant 0 : index
    %c0_2 = arith.constant 0 : index
    %1 = vector.load %arg11[%c0_1, %c0_2] : memref<8x1xf32, #tpu.memory_space<vmem>>, vector<8x1xf32>
    %c0_3 = arith.constant 0 : index
    %c0_4 = arith.constant 0 : index
    %c0_5 = arith.constant 0 : index
    %c0_6 = arith.constant 0 : index
    %2 = vector.load %arg10[%c0_3, %c0_4, %c0_5, %c0_6] : memref<3x3x8x1xf32, #tpu.memory_space<vmem>>, vector<1x1x8x1xf32>
    %3 = vector.shape_cast %2 : vector<1x1x8x1xf32> to vector<8x1xf32>
    %c0_7 = arith.constant 0 : index
    %c1 = arith.constant 1 : index
    %c0_8 = arith.constant 0 : index
    %c0_9 = arith.constant 0 : index
    %4 = vector.load %arg10[%c0_7, %c1, %c0_8, %c0_9] : memref<3x3x8x1xf32, #tpu.memory_space<vmem>>, vector<1x1x8x1xf32>
    %5 = vector.shape_cast %4 : vector<1x1x8x1xf32> to vector<8x1xf32>
    %c0_10 = arith.constant 0 : index
    %c2 = arith.constant 2 : index
    %c0_11 = arith.constant 0 : index
    %c0_12 = arith.constant 0 : index
    %6 = vector.load %arg10[%c0_10, %c2, %c0_11, %c0_12] : memref<3x3x8x1xf32, #tpu.memory_space<vmem>>, vector<1x1x8x1xf32>
    %7 = vector.shape_cast %6 : vector<1x1x8x1xf32> to vector<8x1xf32>
    %c1_13 = arith.constant 1 : index
    %c0_14 = arith.constant 0 : index
    %c0_15 = arith.constant 0 : index
    %c0_16 = arith.constant 0 : index
    %8 = vector.load %arg10[%c1_13, %c0_14, %c0_15, %c0_16] : memref<3x3x8x1xf32, #tpu.memory_space<vmem>>, vector<1x1x8x1xf32>
    %9 = vector.shape_cast %8 : vector<1x1x8x1xf32> to vector<8x1xf32>
    %c1_17 = arith.constant 1 : index
    %c1_18 = arith.constant 1 : index
    %c0_19 = arith.constant 0 : index
    %c0_20 = arith.constant 0 : index
    %10 = vector.load %arg10[%c1_17, %c1_18, %c0_19, %c0_20] : memref<3x3x8x1xf32, #tpu.memory_space<vmem>>, vector<1x1x8x1xf32>
    %11 = vector.shape_cast %10 : vector<1x1x8x1xf32> to vector<8x1xf32>
    %c1_21 = arith.constant 1 : index
    %c2_22 = arith.constant 2 : index
    %c0_23 = arith.constant 0 : index
    %c0_24 = arith.constant 0 : index
    %12 = vector.load %arg10[%c1_21, %c2_22, %c0_23, %c0_24] : memref<3x3x8x1xf32, #tpu.memory_space<vmem>>, vector<1x1x8x1xf32>
    %13 = vector.shape_cast %12 : vector<1x1x8x1xf32> to vector<8x1xf32>
    %c2_25 = arith.constant 2 : index
    %c0_26 = arith.constant 0 : index
    %c0_27 = arith.constant 0 : index
    %c0_28 = arith.constant 0 : index
    %14 = vector.load %arg10[%c2_25, %c0_26, %c0_27, %c0_28] : memref<3x3x8x1xf32, #tpu.memory_space<vmem>>, vector<1x1x8x1xf32>
    %15 = vector.shape_cast %14 : vector<1x1x8x1xf32> to vector<8x1xf32>
    %c2_29 = arith.constant 2 : index
    %c1_30 = arith.constant 1 : index
    %c0_31 = arith.constant 0 : index
    %c0_32 = arith.constant 0 : index
    %16 = vector.load %arg10[%c2_29, %c1_30, %c0_31, %c0_32] : memref<3x3x8x1xf32, #tpu.memory_space<vmem>>, vector<1x1x8x1xf32>
    %17 = vector.shape_cast %16 : vector<1x1x8x1xf32> to vector<8x1xf32>
    %c2_33 = arith.constant 2 : index
    %c2_34 = arith.constant 2 : index
    %c0_35 = arith.constant 0 : index
    %c0_36 = arith.constant 0 : index
    %18 = vector.load %arg10[%c2_33, %c2_34, %c0_35, %c0_36] : memref<3x3x8x1xf32, #tpu.memory_space<vmem>>, vector<1x1x8x1xf32>
    %19 = vector.shape_cast %18 : vector<1x1x8x1xf32> to vector<8x1xf32>
    %c0_37 = arith.constant 0 : index
    %c0_38 = arith.constant 0 : index
    %c0_39 = arith.constant 0 : index
    %c0_40 = arith.constant 0 : index
    %20 = vector.load %arg6[%c0_37, %c0_38, %c0_39, %c0_40] : memref<1x1x4x16xf32, #tpu.memory_space<vmem>>, vector<1x1x4x16xf32>
    %21 = vector.shape_cast %20 : vector<1x1x4x16xf32> to vector<1x4x16xf32>
    %c0_41 = arith.constant 0 : index
    %c0_42 = arith.constant 0 : index
    %c0_43 = arith.constant 0 : index
    %c0_44 = arith.constant 0 : index
    %22 = vector.load %arg5[%c0_41, %c0_42, %c0_43, %c0_44] : memref<1x8x4x16xf32, #tpu.memory_space<vmem>>, vector<1x8x4x16xf32>
    %23 = vector.shape_cast %22 : vector<1x8x4x16xf32> to vector<8x4x16xf32>
    %c0_45 = arith.constant 0 : index
    %c0_46 = arith.constant 0 : index
    %c0_47 = arith.constant 0 : index
    %c0_48 = arith.constant 0 : index
    %24 = vector.load %arg7[%c0_45, %c0_46, %c0_47, %c0_48] : memref<1x1x4x16xf32, #tpu.memory_space<vmem>>, vector<1x1x4x16xf32>
    %25 = vector.shape_cast %24 : vector<1x1x4x16xf32> to vector<1x4x16xf32>
    %26 = tpu.concatenate %21, %23, %25 in 0 : vector<1x4x16xf32>, vector<8x4x16xf32>, vector<1x4x16xf32> -> vector<10x4x16xf32>
    %c0_49 = arith.constant 0 : index
    %c0_50 = arith.constant 0 : index
    %c0_51 = arith.constant 0 : index
    %27 = vector.load %arg8[%c0_49, %c0_50, %c0_51] : memref<4x8x1xf32, #tpu.memory_space<vmem>>, vector<1x8x1xf32>
    %28 = vector.shape_cast %27 : vector<1x8x1xf32> to vector<8x1xf32>
    %c1_52 = arith.constant 1 : index
    %c0_53 = arith.constant 0 : index
    %c0_54 = arith.constant 0 : index
    %29 = vector.load %arg8[%c1_52, %c0_53, %c0_54] : memref<4x8x1xf32, #tpu.memory_space<vmem>>, vector<1x8x1xf32>
    %30 = vector.shape_cast %29 : vector<1x8x1xf32> to vector<8x1xf32>
    %c2_55 = arith.constant 2 : index
    %c0_56 = arith.constant 0 : index
    %c0_57 = arith.constant 0 : index
    %31 = vector.load %arg8[%c2_55, %c0_56, %c0_57] : memref<4x8x1xf32, #tpu.memory_space<vmem>>, vector<1x8x1xf32>
    %32 = vector.shape_cast %31 : vector<1x8x1xf32> to vector<8x1xf32>
    %c3 = arith.constant 3 : index
    %c0_58 = arith.constant 0 : index
    %c0_59 = arith.constant 0 : index
    %33 = vector.load %arg8[%c3, %c0_58, %c0_59] : memref<4x8x1xf32, #tpu.memory_space<vmem>>, vector<1x8x1xf32>
    %34 = vector.shape_cast %33 : vector<1x8x1xf32> to vector<8x1xf32>
    %35 = vector.extract_strided_slice %26 {offsets = [0, 0, 0], sizes = [10, 1, 16], strides = [1, 1, 1]} : vector<10x4x16xf32> to vector<10x1x16xf32>
    %36 = vector.shape_cast %28 : vector<8x1xf32> to vector<1x8x1xf32>
    %37 = vector.broadcast %35 : vector<10x1x16xf32> to vector<10x8x16xf32>
    %38 = vector.broadcast %36 : vector<1x8x1xf32> to vector<10x8x16xf32>
    %39 = arith.mulf %37, %38 : vector<10x8x16xf32>
    %40 = vector.extract_strided_slice %26 {offsets = [0, 1, 0], sizes = [10, 1, 16], strides = [1, 1, 1]} : vector<10x4x16xf32> to vector<10x1x16xf32>
    %41 = vector.shape_cast %30 : vector<8x1xf32> to vector<1x8x1xf32>
    %42 = vector.broadcast %40 : vector<10x1x16xf32> to vector<10x8x16xf32>
    %43 = vector.broadcast %41 : vector<1x8x1xf32> to vector<10x8x16xf32>
    %44 = arith.mulf %42, %43 : vector<10x8x16xf32>
    %45 = arith.addf %39, %44 : vector<10x8x16xf32>
    %46 = vector.extract_strided_slice %26 {offsets = [0, 2, 0], sizes = [10, 1, 16], strides = [1, 1, 1]} : vector<10x4x16xf32> to vector<10x1x16xf32>
    %47 = vector.shape_cast %32 : vector<8x1xf32> to vector<1x8x1xf32>
    %48 = vector.broadcast %46 : vector<10x1x16xf32> to vector<10x8x16xf32>
    %49 = vector.broadcast %47 : vector<1x8x1xf32> to vector<10x8x16xf32>
    %50 = arith.mulf %48, %49 : vector<10x8x16xf32>
    %51 = arith.addf %45, %50 : vector<10x8x16xf32>
    %52 = vector.extract_strided_slice %26 {offsets = [0, 3, 0], sizes = [10, 1, 16], strides = [1, 1, 1]} : vector<10x4x16xf32> to vector<10x1x16xf32>
    %53 = vector.shape_cast %34 : vector<8x1xf32> to vector<1x8x1xf32>
    %54 = vector.broadcast %52 : vector<10x1x16xf32> to vector<10x8x16xf32>
    %55 = vector.broadcast %53 : vector<1x8x1xf32> to vector<10x8x16xf32>
    %56 = arith.mulf %54, %55 : vector<10x8x16xf32>
    %57 = arith.addf %51, %56 : vector<10x8x16xf32>
    %58 = vector.shape_cast %0 : vector<8x1xf32> to vector<1x8x1xf32>
    %59 = vector.broadcast %58 : vector<1x8x1xf32> to vector<10x8x16xf32>
    %60 = arith.addf %57, %59 : vector<10x8x16xf32>
    %c0_i32 = arith.constant 0 : i32
    %61 = arith.cmpi sgt, %arg1, %c0_i32 : i32
    %62 = arith.extui %61 : i1 to i32
    %63 = arith.sitofp %62 : i32 to f32
    %c1_i32 = arith.constant 1 : i32
    %64 = arith.cmpi slt, %arg1, %c1_i32 : i32
    %65 = arith.extui %64 : i1 to i32
    %66 = arith.sitofp %65 : i32 to f32
    %c0_60 = arith.constant 0 : index
    %c0_61 = arith.constant 0 : index
    %c0_62 = arith.constant 0 : index
    %c0_63 = arith.constant 0 : index
    %67 = vector.load %arg3[%c0_60, %c0_61, %c0_62, %c0_63] : memref<1x1x8x16xf32, #tpu.memory_space<vmem>>, vector<1x1x8x16xf32>
    %68 = vector.shape_cast %67 : vector<1x1x8x16xf32> to vector<1x8x16xf32>
    %69 = vector.extract_strided_slice %60 {offsets = [0, 0, 0], sizes = [1, 8, 16], strides = [1, 1, 1]} : vector<10x8x16xf32> to vector<1x8x16xf32>
    %70 = arith.addf %68, %69 : vector<1x8x16xf32>
    %71 = vector.broadcast %63 : f32 to vector<1x8x16xf32>
    %72 = arith.mulf %70, %71 : vector<1x8x16xf32>
    %c0_64 = arith.constant 0 : index
    %c0_65 = arith.constant 0 : index
    %c0_66 = arith.constant 0 : index
    %c0_67 = arith.constant 0 : index
    %73 = vector.load %arg2[%c0_64, %c0_65, %c0_66, %c0_67] : memref<1x8x8x16xf32, #tpu.memory_space<vmem>>, vector<1x8x8x16xf32>
    %74 = vector.shape_cast %73 : vector<1x8x8x16xf32> to vector<8x8x16xf32>
    %75 = vector.extract_strided_slice %60 {offsets = [1, 0, 0], sizes = [8, 8, 16], strides = [1, 1, 1]} : vector<10x8x16xf32> to vector<8x8x16xf32>
    %76 = arith.addf %74, %75 : vector<8x8x16xf32>
    %c0_68 = arith.constant 0 : index
    %c0_69 = arith.constant 0 : index
    %c0_70 = arith.constant 0 : index
    %c0_71 = arith.constant 0 : index
    %77 = vector.load %arg4[%c0_68, %c0_69, %c0_70, %c0_71] : memref<1x1x8x16xf32, #tpu.memory_space<vmem>>, vector<1x1x8x16xf32>
    %78 = vector.shape_cast %77 : vector<1x1x8x16xf32> to vector<1x8x16xf32>
    %79 = vector.extract_strided_slice %60 {offsets = [9, 0, 0], sizes = [1, 8, 16], strides = [1, 1, 1]} : vector<10x8x16xf32> to vector<1x8x16xf32>
    %80 = arith.addf %78, %79 : vector<1x8x16xf32>
    %81 = vector.broadcast %66 : f32 to vector<1x8x16xf32>
    %82 = arith.mulf %80, %81 : vector<1x8x16xf32>
    %83 = tpu.concatenate %72, %76, %82 in 0 : vector<1x8x16xf32>, vector<8x8x16xf32>, vector<1x8x16xf32> -> vector<10x8x16xf32>
    %cst = arith.constant 0.000000e+00 : f32
    %84 = vector.broadcast %cst : f32 to vector<10x8x1xf32>
    %85 = vector.extract_strided_slice %83 {offsets = [0, 0, 0], sizes = [10, 8, 15], strides = [1, 1, 1]} : vector<10x8x16xf32> to vector<10x8x15xf32>
    %86 = tpu.concatenate %84, %85 in 2 : vector<10x8x1xf32>, vector<10x8x15xf32> -> vector<10x8x16xf32>
    %87 = vector.extract_strided_slice %83 {offsets = [0, 0, 1], sizes = [10, 8, 15], strides = [1, 1, 1]} : vector<10x8x16xf32> to vector<10x8x15xf32>
    %88 = tpu.concatenate %87, %84 in 2 : vector<10x8x15xf32>, vector<10x8x1xf32> -> vector<10x8x16xf32>
    %89 = vector.extract_strided_slice %86 {offsets = [0, 0, 0], sizes = [8, 8, 16], strides = [1, 1, 1]} : vector<10x8x16xf32> to vector<8x8x16xf32>
    %90 = vector.shape_cast %3 : vector<8x1xf32> to vector<1x8x1xf32>
    %91 = vector.broadcast %90 : vector<1x8x1xf32> to vector<8x8x16xf32>
    %92 = arith.mulf %89, %91 : vector<8x8x16xf32>
    %93 = vector.extract_strided_slice %83 {offsets = [0, 0, 0], sizes = [8, 8, 16], strides = [1, 1, 1]} : vector<10x8x16xf32> to vector<8x8x16xf32>
    %94 = vector.shape_cast %5 : vector<8x1xf32> to vector<1x8x1xf32>
    %95 = vector.broadcast %94 : vector<1x8x1xf32> to vector<8x8x16xf32>
    %96 = arith.mulf %93, %95 : vector<8x8x16xf32>
    %97 = arith.addf %92, %96 : vector<8x8x16xf32>
    %98 = vector.extract_strided_slice %88 {offsets = [0, 0, 0], sizes = [8, 8, 16], strides = [1, 1, 1]} : vector<10x8x16xf32> to vector<8x8x16xf32>
    %99 = vector.shape_cast %7 : vector<8x1xf32> to vector<1x8x1xf32>
    %100 = vector.broadcast %99 : vector<1x8x1xf32> to vector<8x8x16xf32>
    %101 = arith.mulf %98, %100 : vector<8x8x16xf32>
    %102 = arith.addf %97, %101 : vector<8x8x16xf32>
    %103 = vector.extract_strided_slice %86 {offsets = [1, 0, 0], sizes = [8, 8, 16], strides = [1, 1, 1]} : vector<10x8x16xf32> to vector<8x8x16xf32>
    %104 = vector.shape_cast %9 : vector<8x1xf32> to vector<1x8x1xf32>
    %105 = vector.broadcast %104 : vector<1x8x1xf32> to vector<8x8x16xf32>
    %106 = arith.mulf %103, %105 : vector<8x8x16xf32>
    %107 = vector.extract_strided_slice %83 {offsets = [1, 0, 0], sizes = [8, 8, 16], strides = [1, 1, 1]} : vector<10x8x16xf32> to vector<8x8x16xf32>
    %108 = vector.shape_cast %11 : vector<8x1xf32> to vector<1x8x1xf32>
    %109 = vector.broadcast %108 : vector<1x8x1xf32> to vector<8x8x16xf32>
    %110 = arith.mulf %107, %109 : vector<8x8x16xf32>
    %111 = arith.addf %106, %110 : vector<8x8x16xf32>
    %112 = vector.extract_strided_slice %88 {offsets = [1, 0, 0], sizes = [8, 8, 16], strides = [1, 1, 1]} : vector<10x8x16xf32> to vector<8x8x16xf32>
    %113 = vector.shape_cast %13 : vector<8x1xf32> to vector<1x8x1xf32>
    %114 = vector.broadcast %113 : vector<1x8x1xf32> to vector<8x8x16xf32>
    %115 = arith.mulf %112, %114 : vector<8x8x16xf32>
    %116 = arith.addf %111, %115 : vector<8x8x16xf32>
    %117 = arith.addf %102, %116 : vector<8x8x16xf32>
    %118 = vector.extract_strided_slice %86 {offsets = [2, 0, 0], sizes = [8, 8, 16], strides = [1, 1, 1]} : vector<10x8x16xf32> to vector<8x8x16xf32>
    %119 = vector.shape_cast %15 : vector<8x1xf32> to vector<1x8x1xf32>
    %120 = vector.broadcast %119 : vector<1x8x1xf32> to vector<8x8x16xf32>
    %121 = arith.mulf %118, %120 : vector<8x8x16xf32>
    %122 = vector.extract_strided_slice %83 {offsets = [2, 0, 0], sizes = [8, 8, 16], strides = [1, 1, 1]} : vector<10x8x16xf32> to vector<8x8x16xf32>
    %123 = vector.shape_cast %17 : vector<8x1xf32> to vector<1x8x1xf32>
    %124 = vector.broadcast %123 : vector<1x8x1xf32> to vector<8x8x16xf32>
    %125 = arith.mulf %122, %124 : vector<8x8x16xf32>
    %126 = arith.addf %121, %125 : vector<8x8x16xf32>
    %127 = vector.extract_strided_slice %88 {offsets = [2, 0, 0], sizes = [8, 8, 16], strides = [1, 1, 1]} : vector<10x8x16xf32> to vector<8x8x16xf32>
    %128 = vector.shape_cast %19 : vector<8x1xf32> to vector<1x8x1xf32>
    %129 = vector.broadcast %128 : vector<1x8x1xf32> to vector<8x8x16xf32>
    %130 = arith.mulf %127, %129 : vector<8x8x16xf32>
    %131 = arith.addf %126, %130 : vector<8x8x16xf32>
    %132 = arith.addf %117, %131 : vector<8x8x16xf32>
    %133 = vector.shape_cast %1 : vector<8x1xf32> to vector<1x8x1xf32>
    %134 = vector.broadcast %133 : vector<1x8x1xf32> to vector<8x8x16xf32>
    %135 = arith.addf %132, %134 : vector<8x8x16xf32>
    %136 = arith.negf %135 : vector<8x8x16xf32>
    %137 = math.exp %136 : vector<8x8x16xf32>
    %cst_72 = arith.constant 1.000000e+00 : f32
    %138 = vector.broadcast %cst_72 : f32 to vector<8x8x16xf32>
    %139 = arith.addf %138, %137 : vector<8x8x16xf32>
    %140 = arith.divf %138, %139 : vector<8x8x16xf32>
    %c0_73 = arith.constant 0 : index
    %c0_74 = arith.constant 0 : index
    %c0_75 = arith.constant 0 : index
    %c0_76 = arith.constant 0 : index
    %141 = vector.load %arg2[%c0_73, %c0_74, %c0_75, %c0_76] : memref<1x8x8x16xf32, #tpu.memory_space<vmem>>, vector<1x8x8x16xf32>
    %142 = vector.shape_cast %141 : vector<1x8x8x16xf32> to vector<8x8x16xf32>
    %143 = arith.addf %142, %140 : vector<8x8x16xf32>
    %c0_77 = arith.constant 0 : index
    %c0_78 = arith.constant 0 : index
    %c0_79 = arith.constant 0 : index
    %c0_80 = arith.constant 0 : index
    %144 = vector.load %arg12[%c0_77, %c0_78, %c0_79, %c0_80] : memref<1x8x8x16xf32, #tpu.memory_space<vmem>>, vector<1x8x8x16xf32>
    %145 = vector.shape_cast %144 : vector<1x8x8x16xf32> to vector<8x8x16xf32>
    %146 = vector.shape_cast %143 : vector<8x8x16xf32> to vector<1x8x8x16xf32>
    tpu.vector_store %arg12[%c0_77, %c0_78, %c0_79, %c0_80], %146 {strides = array<i32>} : memref<1x8x8x16xf32, #tpu.memory_space<vmem>>, vector<1x8x8x16xf32>,
    return
  }
  func.func @transform_0(%arg0: i32, %arg1: i32) -> (i32, i32, i32, i32) {
    %c0_i32 = arith.constant 0 : i32
    %c0_i32_0 = arith.constant 0 : i32
    %c0_i32_1 = arith.constant 0 : i32
    return %arg0, %arg1, %c0_i32, %c0_i32_0 : i32, i32, i32, i32
  }
  func.func @transform_1(%arg0: i32, %arg1: i32) -> (i32, i32, i32, i32) {
    %c8_i32 = arith.constant 8 : i32
    %0 = arith.muli %arg1, %c8_i32 : i32
    %c1_i32 = arith.constant 1 : i32
    %1 = arith.subi %0, %c1_i32 : i32
    %c0_i32 = arith.constant 0 : i32
    %2 = arith.maxsi %1, %c0_i32 : i32
    %c0_i32_0 = arith.constant 0 : i32
    %c0_i32_1 = arith.constant 0 : i32
    %c0_i32_2 = arith.constant 0 : i32
    return %arg0, %2, %c0_i32_0, %c0_i32_1 : i32, i32, i32, i32
  }
  func.func @transform_2(%arg0: i32, %arg1: i32) -> (i32, i32, i32, i32) {
    %c8_i32 = arith.constant 8 : i32
    %0 = arith.muli %arg1, %c8_i32 : i32
    %c8_i32_0 = arith.constant 8 : i32
    %1 = arith.addi %0, %c8_i32_0 : i32
    %c15_i32 = arith.constant 15 : i32
    %2 = arith.minsi %1, %c15_i32 : i32
    %c0_i32 = arith.constant 0 : i32
    %c0_i32_1 = arith.constant 0 : i32
    %c0_i32_2 = arith.constant 0 : i32
    return %arg0, %2, %c0_i32, %c0_i32_1 : i32, i32, i32, i32
  }
  func.func @transform_3(%arg0: i32, %arg1: i32) -> (i32, i32, i32, i32) {
    %c0_i32 = arith.constant 0 : i32
    %c0_i32_0 = arith.constant 0 : i32
    %c0_i32_1 = arith.constant 0 : i32
    return %arg0, %arg1, %c0_i32, %c0_i32_0 : i32, i32, i32, i32
  }
  func.func @transform_4(%arg0: i32, %arg1: i32) -> (i32, i32, i32, i32) {
    %c8_i32 = arith.constant 8 : i32
    %0 = arith.muli %arg1, %c8_i32 : i32
    %c1_i32 = arith.constant 1 : i32
    %1 = arith.subi %0, %c1_i32 : i32
    %c0_i32 = arith.constant 0 : i32
    %2 = arith.maxsi %1, %c0_i32 : i32
    %c0_i32_0 = arith.constant 0 : i32
    %c0_i32_1 = arith.constant 0 : i32
    %c0_i32_2 = arith.constant 0 : i32
    return %arg0, %2, %c0_i32_0, %c0_i32_1 : i32, i32, i32, i32
  }
  func.func @transform_5(%arg0: i32, %arg1: i32) -> (i32, i32, i32, i32) {
    %c8_i32 = arith.constant 8 : i32
    %0 = arith.muli %arg1, %c8_i32 : i32
    %c8_i32_0 = arith.constant 8 : i32
    %1 = arith.addi %0, %c8_i32_0 : i32
    %c15_i32 = arith.constant 15 : i32
    %2 = arith.minsi %1, %c15_i32 : i32
    %c0_i32 = arith.constant 0 : i32
    %c0_i32_1 = arith.constant 0 : i32
    %c0_i32_2 = arith.constant 0 : i32
    return %arg0, %2, %c0_i32, %c0_i32_1 : i32, i32, i32, i32
  }
  func.func @transform_6(%arg0: i32, %arg1: i32) -> (i32, i32, i32) {
    %c0_i32 = arith.constant 0 : i32
    %c0_i32_0 = arith.constant 0 : i32
    %c0_i32_1 = arith.constant 0 : i32
    %c0_i32_2 = arith.constant 0 : i32
    return %c0_i32, %c0_i32_0, %c0_i32_1 : i32, i32, i32
  }
  func.func @transform_7(%arg0: i32, %arg1: i32) -> (i32, i32) {
    %c0_i32 = arith.constant 0 : i32
    %c0_i32_0 = arith.constant 0 : i32
    %c0_i32_1 = arith.constant 0 : i32
    return %c0_i32, %c0_i32_0 : i32, i32
  }
  func.func @transform_8(%arg0: i32, %arg1: i32) -> (i32, i32, i32, i32) {
    %c0_i32 = arith.constant 0 : i32
    %c0_i32_0 = arith.constant 0 : i32
    %c0_i32_1 = arith.constant 0 : i32
    %c0_i32_2 = arith.constant 0 : i32
    %c0_i32_3 = arith.constant 0 : i32
    return %c0_i32, %c0_i32_0, %c0_i32_1, %c0_i32_2 : i32, i32, i32, i32
  }
  func.func @transform_9(%arg0: i32, %arg1: i32) -> (i32, i32) {
    %c0_i32 = arith.constant 0 : i32
    %c0_i32_0 = arith.constant 0 : i32
    %c0_i32_1 = arith.constant 0 : i32
    return %c0_i32, %c0_i32_0 : i32, i32
  }
  func.func @transform_10(%arg0: i32, %arg1: i32) -> (i32, i32, i32, i32) {
    %c0_i32 = arith.constant 0 : i32
    %c0_i32_0 = arith.constant 0 : i32
    %c0_i32_1 = arith.constant 0 : i32
    return %arg0, %arg1, %c0_i32, %c0_i32_0 : i32, i32, i32, i32
  }
}

</mosaic_0001>

<bundles_post_ra>
// kernel: tpu_custom_call.1
= control target key start
LH: loop header
LB: loop body
LE: loop exit
PB: predicated region body
PF: predicated region fallthrough
CT: control target
= control target key end

     0   :  { %s3196_s0 = inlined_call_operand.hbm [shape: f32[2,16,8,16], index: 0, kind: input, shape index: {}]   ;;  %s3197_s1 = inlined_call_operand.hbm [shape: f32[2,16,8,16], index: 1, kind: input, shape index: {}]   ;;  %s3198_s2 = inlined_call_operand.hbm [shape: f32[2,16,8,16], index: 2, kind: input, shape index: {}]   ;;  %s3199_s3 = inlined_call_operand.vmem [shape: f32[2,16,4,16], index: 3, kind: input, shape index: {}]   ;;  %s3200_s4 = inlined_call_operand.hbm [shape: f32[2,16,4,16], index: 4, kind: input, shape index: {}]   ;;  %s3201_s5 = inlined_call_operand.hbm [shape: f32[2,16,4,16], index: 5, kind: input, shape index: {}]   ;;  %s3202_s6 = inlined_call_operand.vmem [shape: f32[4,8,1], index: 6, kind: input, shape index: {}]   ;;  %s3203_s7 = inlined_call_operand.vmem [shape: f32[8,1], index: 7, kind: input, shape index: {}]   ;;  %s3204_s8 = inlined_call_operand.vmem [shape: f32[3,3,8,1], index: 8, kind: input, shape index: {}]   ;;  %s3205_s9 = inlined_call_operand.vmem [shape: f32[8,1], index: 9, kind: input, shape index: {}]   ;;  %s3206_s10 = inlined_call_operand.hbm [shape: f32[2,16,8,16], index: 10, kind: output, shape index: {}]  }
   0x1   :  { %3240 = sst [smem:[#allocation35_spill]] %s3196_s0 }
   0x2   :  { %3241 = sst [smem:[#allocation36_spill]] %s3197_s1 }
   0x3   :  { %3242 = sst [smem:[#allocation37_spill]] %s3198_s2 }
   0x4   :  { %3243 = sst [smem:[#allocation38_spill]] %s3199_s3 }
   0x5   :  { %3244 = sst [smem:[#allocation39_spill]] %s3200_s4 }
   0x6   :  { %3245 = sst [smem:[#allocation40_spill]] %s3201_s5 }
   0x7   :  { %3246 = sst [smem:[#allocation41_spill]] %s3202_s6 }
   0x8   :  { %3247 = sst [smem:[#allocation42_spill]] %s3203_s7 }
   0x9   :  { %3248 = sst [smem:[#allocation43_spill]] %s3204_s8 }
   0xa   :  { %3249 = sst [smem:[#allocation44_spill]] %s3205_s9 }
   0xb   :  { %3250 = sst [smem:[#allocation45_spill]] %s3206_s10 }
   0xc   :  { %15 = vsyncpa [#allocation3], 0 }
   0xd   :  { %17 = vsyncpa [#allocation3 + $0x1], 0 }
   0xe   :  { %18 = vsyncpa [#allocation6], 0 }
   0xf   :  { %20 = vsyncpa [#allocation6 + $0x1], 0 }
  0x10   :  { %21 = vsyncpa [#allocation9], 0 }
  0x11   :  { %23 = vsyncpa [#allocation9 + $0x1], 0 }
  0x12   :  { %24 = vsyncpa [#allocation4], 0 }
  0x13   :  { %26 = vsyncpa [#allocation4 + $0x1], 0  ;;  %s2198_s13 = smov 0   ;;  %s2200_s14 = smov 0  }
  0x14   :  { %s2202_s15 = smov 0   ;;  %s2204_s16 = smov 0  }
  0x15   :  { %s2206_s17 = smov 0   ;;  %s2208_s18 = smov 0  }
  0x16   :  { %s2210_s19 = smov 0   ;;  %s2212_s20 = smov 0  }
  0x17   :  { %s2214_s21 = smov 0   ;;  %s2216_s22 = smov 0  }
  0x18   :  { %s2218_s23 = smov 0   ;;  %s2220_s24 = smov 0  }
  0x19   :  { %s2222_s25 = smov 0   ;;  %s2224_s26 = smov 0  }
  0x1a LB: > { %3251 = sst [smem:[#allocation18_spill]] %s2092_s17  ;;  %s2269_s27 = sadd.s32 4294967295, %s2128_s26   ;;  %s2128_s26 = sphi %s2224_s26, %s32_s26   ;;  %s2124_s25 = sphi %s2222_s25, %s3329_s25   ;;  %s2120_s24 = sphi %s2220_s24, %s3328_s24   ;;  %s2116_s23 = sphi %s2218_s23, %s3327_s23   ;;  %s2112_s22 = sphi %s2216_s22, %s3326_s22   ;;  %s2108_s21 = sphi %s2214_s21, %s3337_s21   ;;  %s2104_s20 = sphi %s2212_s20, %s3336_s20   ;;  %s2100_s19 = sphi %s2210_s19, %s3335_s19   ;;  %s2096_s18 = sphi %s2208_s18, %s3334_s18   ;;  %s2092_s17 = sphi %s2206_s17, %s3333_s17   ;;  %s2088_s16 = sphi %s2204_s16, %s3324_s16   ;;  %s2084_s15 = sphi %s2202_s15, %s3332_s15   ;;  %s2080_s14 = sphi %s2200_s14, %s3331_s14   ;;  %s2076_s13 = sphi %s2198_s13, %s3330_s13  }
  0x1b   : > { %3252 = sst [smem:[#allocation19_spill]] %s2112_s22  ;;  %s41_s28 = sadd.s32 1, %s2120_s24 }
  0x1c   : > { %3253 = sst [smem:[#allocation20_spill]] %s2116_s23  ;;  %p42_p0 = scmp.ge.s32.totalorder %s41_s28, 2 }
  0x1d   : > { %3254 = sst [smem:[#allocation21_spill]] %s2120_s24  ;;  %s44_s29 = sadd.s32 1, %s2124_s25 }
  0x1e   : > { %3255 = sst [smem:[#allocation22_spill]] %s2124_s25  ;;  %p3224_p1 = scmp.eq.s32.totalorder %s2128_s26, 0 }
  0x1f   : > { %p3223_p2 = scmp.eq.s32.totalorder %s2269_s27, 0  ;;  %s3339_s28 = smov (%p42_p0, %s41_s28), 0 }
  0x20   : > { %3256 = sst [smem:[#allocation23_spill]] %s3339_s28  ;;  %s3341_s29 = smov (!%p42_p0, %s44_s29), %s2124_s25 }
  0x21   : > { %s49_s30 = ssub.s32 %s2120_s24, %s3339_s28  ;;  %s2281_s11 = sshll.u32 %s2120_s24, 3 }
  0x22   : > { %p46_p3 = scmp.ge.s32.totalorder %s3341_s29, 2  ;;  %s1559_s12 = sadd.s32 4294967295, %s2281_s11 }
  0x23   : > { %p78_p4 = scmp.gt.s32.totalorder %s1559_s12, 0  ;;  %s1560_s10 = sshll.u32 %s3339_s28, 3 }
  0x24   : > { %s3343_s29 = smov (%p46_p3, %s3341_s29), 0  ;;  %s1561_s3 = sadd.s32 4294967295, %s1560_s10 }
  0x25   : > { %3257 = sst [smem:[#allocation24_spill]] %s3343_s29  ;;  %s3345_s12 = smov (!%p78_p4, %s1559_s12), 0 }
  0x26   : > { %s2289_s9 = ssub.s32 %s2124_s25, %s3343_s29  ;;  %p82_p5 = scmp.gt.s32.totalorder %s1561_s3, 0 }
  0x27   : > { %3258 = sst [smem:[#allocation25_spill]] %s2289_s9  ;;  %s2292_s24 = sor.u32 %s49_s30, %s2289_s9 }
  0x28   : > { %s89_s28 = sadd.s32 1, %s2096_s18  ;;  %s3347_s3 = smov (!%p82_p5, %s1561_s3), 0 }
  0x29   : > { %p96_p7 = scmp.ne.s32.totalorder %s2096_s18, %s2092_s17  ;;  %p102_p8 = scmp.ne.s32.totalorder %s2092_s17, %s2088_s16 }
  0x2a   : > { %s85_s23 = ssub.s32 %s3345_s12, %s3347_s3  ;;  %s2300_s29 = sadd.s32 8, %s1560_s10 }
  0x2b   : > { %s86_s22 = sor.u32 %s85_s23, %s2289_s9  ;;  %p2305_p9 = por %p96_p7, %p3224_p1 }
  0x2c   : > { %p87_p10 = scmp.eq.s32.totalorder %s86_s22, 0  ;;  %p2311_p11 = por %p102_p8, %p3223_p2 }
  0x2d   : > { %p3222_p13 = scmp.lt.s32.totalorder %s2128_s26, 4  ;;  %s2321_s10 = sshll.u32 %s2124_s25, 4 }
  0x2e   : > { %s3260_s30 = scalar_select %p2311_p11, 1, 0 }
  0x2f   : > { %s2317_s3 = scalar_select %p87_p10, %s2096_s18, %s89_s28  }
  0x30   : > { %3261 = sst [smem:[#allocation26_spill]] %s3260_s30  ;;  %s409_s16 = sand.u32 1, %s2128_s26  }
  0x31   : > { %s411_s23 = sand.u32 1, %s2096_s18   ;;  %s2326_s6 = sadd.s32 %s2321_s10, %s3345_s12 }
  0x32   : > { %s1576_s8 = sshll.u32 %s411_s23, 3  ;;  %s1580_s22 = sshll.u32 %s2326_s6, 7 }
  0x33   : > { %s413_s17 = scalar_lea.vmem [#allocation5], %s1576_s8  ;;  %s3262_s1 = sld [smem:[#allocation36_spill]] }
  0x34   : > { %s426_s5 = sshll.u32 %s413_s17, 4  ;;  %p2340_p0 = pnand %p3222_p13, %p2305_p9  ;;  %s2334_s5 = int_to_ptr.vmem [resolvable:$true] %s426_s5 }
  0x35   : > { %s2346_s8 = sshll.u32 %s411_s23, 2  ;;  %s2350_s2 = scalar_lea.sflag [#allocation6], %s409_s16 }
  0x36   : > { %p1818_p7 = pneg %p2340_p0 }
  0x39   : > { %s2332_s9 = scalar_lea.hbm %s3262_s1, %s1580_s22  ;;  %s1821_s30 = scalar_lea.hbm %s3262_s1, 4096 }
  0x3a   : > { %s1816_s17 = scalar_lea.hbm %s2332_s9, 128  ;;  %p1822_p10 = scmp.lt.u32.totalorder %s2332_s9, %s3262_s1 }
  0x3b   : > { %p1817_p5 = scmp.ne.s32.totalorder %s2332_s9, %s1816_s17  ;;  %p1823_p12 = scmp.lt.u32.totalorder %s1821_s30, %s1816_s17 }
  0x3c   : > { %p1825_p2 = scmp.lt.u32.totalorder %s1816_s17, %s2332_s9 }
  0x3d   : > { %p1819_p8 = pnand %p1818_p7, %p1817_p5  ;;  %p1824_p13 = por %p1823_p12, %p1822_p10 }
  0x3f   : > { %p1820_p9 = pneg %p1819_p8  ;;  %p1826_p1 = por %p1825_p2, %p1824_p13 }
  0x41   : > { %p1827_p6 = pnand %p1826_p1, %p1820_p9 }
  0x43   : > { %1830 = shalt.err (!%p1827_p6)
}
  0x44   : > { %s1831_s23 = scalar_lea.vmem %s2334_s5, 128  ;;  %s2130_s7 = smov [#allocation5]  }
  0x45   : > { %p1832_p5 = scmp.ne.s32.totalorder %s2334_s5, %s1831_s23  ;;  %s1836_s12 = sshll.u32 %s2130_s7, 4  ;;  %s1837_s12 = int_to_ptr.vmem [resolvable:$false] %s1836_s12 }
  0x46   : > { %s1838_s25 = scalar_lea.vmem %s1837_s12, 256  ;;  %p1839_p4 = scmp.lt.s32.totalorder %s2334_s5, %s1837_s12 }
  0x47   : > { %p1834_p8 = pnand %p1832_p5, %p1818_p7  ;;  %p1840_p12 = scmp.lt.s32.totalorder %s1838_s25, %s1831_s23 }
  0x49   : > { %p1835_p3 = pneg %p1834_p8  ;;  %p1841_p10 = por %p1840_p12, %p1839_p4 }
  0x4b   : > { %p1842_p2 = pnand %p1841_p10, %p1835_p3 }
  0x4d   : > { %1845 = shalt.err (!%p1842_p2)
}
  0x4e   : > { %1647 = dma.hbm_to_vmem [thread:$0]  (!%p2340_p0), %s2332_s9, 128, %s2334_s5, %s2350_s2  }
  0x4f   : > { %p3264_p1 = scmp.lt.s32.totalorder %s2128_s26, 5  ;;  %p3265_p6 = scmp.ge.s32.totalorder %s2128_s26, 1 }
  0x50   : > { %s1589_s30 = sshll.u32 %s2326_s6, 6  ;;  %s474_s22 = scalar_lea.vmem [#allocation8], %s2346_s8 }
  0x51   : > { %p2382_p13 = pnand %p3265_p6, %p3264_p1  ;;  %s487_s23 = sshll.u32 %s474_s22, 4  ;;  %s488_s23 = int_to_ptr.vmem [resolvable:$true] %s487_s23 }
  0x52   : > { %s3267_s4 = sld [smem:[#allocation39_spill]]  ;;  %s2395_s5 = scalar_lea.sflag [#allocation9], %s409_s16 }
  0x53   : > { %s3266_s17 = scalar_select %p2382_p13, 1, 0 }
  0x58   : > { %s2391_s25 = scalar_lea.hbm %s3267_s4, %s1589_s30  ;;  %s1851_s22 = scalar_lea.hbm %s3267_s4, 2048 }
  0x59   : > { %s1846_s9 = scalar_lea.hbm %s2391_s25, 64  ;;  %p1852_p5 = scmp.lt.u32.totalorder %s2391_s25, %s3267_s4 }
  0x5a   : > { %p1847_p3 = scmp.ne.s32.totalorder %s2391_s25, %s1846_s9  ;;  %p1853_p8 = scmp.lt.u32.totalorder %s1851_s22, %s1846_s9 }
  0x5b   : > { %p1855_p10 = scmp.lt.u32.totalorder %s1846_s9, %s2391_s25 }
  0x5c   : > { %p1849_p4 = pnand %p1847_p3, %p1818_p7  ;;  %p1854_p12 = por %p1853_p8, %p1852_p5 }
  0x5e   : > { %p1850_p9 = pneg %p1849_p4  ;;  %p1856_p2 = por %p1855_p10, %p1854_p12 }
  0x60   : > { %p1857_p1 = pnand %p1856_p2, %p1850_p9 }
  0x62   : > { %1860 = shalt.err (!%p1857_p1)
}
  0x63   : > { %s1861_s16 = scalar_lea.vmem %s488_s23, 64  ;;  %s2131_s12 = smov [#allocation8]  }
  0x64   : > { %p1862_p6 = scmp.ne.s32.totalorder %s488_s23, %s1861_s16  ;;  %s1866_s6 = sshll.u32 %s2131_s12, 4  ;;  %s1867_s6 = int_to_ptr.vmem [resolvable:$false] %s1866_s6 }
  0x65   : > { %s1868_s8 = scalar_lea.vmem %s1867_s6, 128  ;;  %p1869_p11 = scmp.lt.s32.totalorder %s488_s23, %s1867_s6 }
  0x66   : > { %p1864_p3 = pnand %p1862_p6, %p1818_p7  ;;  %p1870_p13 = scmp.lt.s32.totalorder %s1868_s8, %s1861_s16 }
  0x68   : > { %p1865_p4 = pneg %p1864_p3  ;;  %p1871_p5 = por %p1870_p13, %p1869_p11 }
  0x6a   : > { %p1872_p8 = pnand %p1871_p5, %p1865_p4 }
  0x6c   : > { %1875 = shalt.err (!%p1872_p8)
}
  0x6d   : > { %1653 = dma.hbm_to_vmem [thread:$0]  (!%p2340_p0), %s2391_s25, 64, %s488_s23, %s2395_s5  }
  0x6e   : > { %s1557_s9 = sadd.s32 4294967294, %s2128_s26   ;;  %s53_s22 = sadd.s32 1, %s2108_s21 }
  0x6f   : > { %p3268_p11 = scmp.eq.s32.totalorder %s2292_s24, 0  ;;  %p60_p7 = scmp.ne.s32.totalorder %s2108_s21, %s2104_s20 }
  0x70   : > { %p66_p13 = scmp.ne.s32.totalorder %s2104_s20, %s2100_s19  ;;  %p348_p9 = scmp.eq.s32.totalorder %s2269_s27, 3 }
  0x71   : > { %s2422_s28 = scalar_select %p3268_p11, %s2108_s21, %s53_s22  }
  0x72   : > { %p354_p12 = scmp.eq.s32.totalorder %s1557_s9, 3  ;;  %p3270_p10 = scmp.eq.s32.totalorder %s2128_s26, 0 }
  0x73   : > { %3269 = sst [smem:[#allocation27_spill]] %s2422_s28  ;;  %p3271_p1 = scmp.eq.s32.totalorder %s2269_s27, 0 }
  0x74   : > { %p62_p2 = por %p3270_p10, %p60_p7  ;;  %p2437_p3 = por %p348_p9, %p60_p7 }
  0x75   : > { %p2433_p6 = por %p3271_p1, %p66_p13  ;;  %p2441_p0 = por %p354_p12, %p66_p13 }
  0x76   : > { %s3273_s7 = scalar_select %p2437_p3, 1, 0 }
  0x77   : > { %s3272_s30 = scalar_select %p2433_p6, 1, 0 }
  0x78   : > { %s3274_s24 = scalar_select %p2441_p0, 1, 0 }
  0x79   : > { %s386_s23 = sand.u32 1, %s2108_s21   ;;  %s396_s25 = sadd.s32 %s2321_s10, %s2281_s11 }
  0x7a   : > { %s1572_s16 = sshll.u32 %s386_s23, 6  ;;  %s1575_s12 = sshll.u32 %s396_s25, 7 }
  0x7b   : > { %s3275_s0 = sld [smem:[#allocation35_spill]]  ;;  %s390_s22 = scalar_lea.vmem [#allocation2], %s1572_s16 }
  0x7c   : > { %s399_s1 = sshll.u32 %s390_s22, 4  ;;  %p3276_p4 = scmp.lt.s32.totalorder %s2128_s26, 4  ;;  %s2453_s1 = int_to_ptr.vmem [resolvable:$true] %s399_s1 }
  0x7d   : > { %s2461_s25 = scalar_lea.sflag [#allocation3], %s386_s23 }
  0x7e   : > { %p2457_p5 = pnand %p3276_p4, %p62_p2 }
  0x80   : > { %p1878_p11 = pneg %p2457_p5 }
  0x81   : > { %s2451_s9 = scalar_lea.hbm %s3275_s0, %s1575_s12  ;;  %s1881_s8 = scalar_lea.hbm %s3275_s0, 4096 }
  0x82   : > { %s1876_s6 = scalar_lea.hbm %s2451_s9, 1024  ;;  %p1882_p9 = scmp.lt.u32.totalorder %s2451_s9, %s3275_s0 }
  0x83   : > { %p1877_p8 = scmp.ne.s32.totalorder %s2451_s9, %s1876_s6  ;;  %p1883_p12 = scmp.lt.u32.totalorder %s1881_s8, %s1876_s6 }
  0x84   : > { %p1885_p2 = scmp.lt.u32.totalorder %s1876_s6, %s2451_s9 }
  0x85   : > { %p1879_p7 = pnand %p1878_p11, %p1877_p8  ;;  %p1884_p10 = por %p1883_p12, %p1882_p9 }
  0x87   : > { %p1880_p13 = pneg %p1879_p7  ;;  %p1886_p1 = por %p1885_p2, %p1884_p10 }
  0x89   : > { %p1887_p4 = pnand %p1886_p1, %p1880_p13 }
  0x8b   : > { %1890 = shalt.err (!%p1887_p4)
}
  0x8c   : > { %s1891_s23 = scalar_lea.vmem %s2453_s1, 1024  ;;  %s2132_s16 = smov [#allocation2]  }
  0x8d   : > { %p1892_p8 = scmp.ne.s32.totalorder %s2453_s1, %s1891_s23  ;;  %s1896_s12 = sshll.u32 %s2132_s16, 4  ;;  %s1897_s12 = int_to_ptr.vmem [resolvable:$false] %s1896_s12 }
  0x8e   : > { %s1898_s28 = scalar_lea.vmem %s1897_s12, 2048  ;;  %p1899_p3 = scmp.lt.s32.totalorder %s2453_s1, %s1897_s12 }
  0x8f   : > { %p1894_p7 = pnand %p1892_p8, %p1878_p11  ;;  %p1900_p9 = scmp.lt.s32.totalorder %s1898_s28, %s1891_s23 }
  0x91   : > { %p1895_p0 = pneg %p1894_p7  ;;  %p1901_p12 = por %p1900_p9, %p1899_p3 }
  0x93   : > { %p1902_p10 = pnand %p1901_p12, %p1895_p0 }
  0x95   : > { %1905 = shalt.err (!%p1902_p10)
}
  0x96   : > { %s2133_s6 = smov 128   ;;  %s3278_s8 = sld [smem:[#allocation25_spill]] }
  0x97   : > { %s2134_s22 = smov 8   ;;  %s113_s23 = sadd.s32 8, %s2281_s11 }
  0x98   : > { %1644 = dma.hbm_to_vmem [thread:$0]  (!%p2457_p5), %s2451_s9, 1024, %s2453_s1, %s2461_s25, %s2133_s6, %s2133_s6, %s2134_s22  }
  0x99   : > { %p114_p3 = scmp.lt.s32.totalorder %s113_s23, 15  ;;  %s125_s16 = sadd.s32 1, %s2084_s15 }
  0x9a   : > { %p3279_p0 = scmp.lt.s32.totalorder %s2300_s29, 15  ;;  %p132_p11 = scmp.ne.s32.totalorder %s2084_s15, %s2080_s14 }
  0x9b   : > { %s3351_s23 = smov (!%p114_p3, %s113_s23), 15  ;;  %p138_p13 = scmp.ne.s32.totalorder %s2080_s14, %s2076_s13 }
  0x9c   : > { %s3349_s29 = smov (!%p3279_p0, %s2300_s29), 15  ;;  %s435_s28 = sand.u32 1, %s2084_s15  }
  0x9d   : > { %s121_s12 = ssub.s32 %s3351_s23, %s3349_s29  ;;  %p3280_p2 = scmp.eq.s32.totalorder %s2128_s26, 0 }
  0x9e   : > { %s122_s0 = sor.u32 %s121_s12, %s3278_s8  ;;  %p3281_p8 = scmp.eq.s32.totalorder %s2269_s27, 0 }
  0x9f   : > { %p134_p1 = por %p132_p11, %p3280_p2  ;;  %p123_p4 = scmp.eq.s32.totalorder %s122_s0, 0 }
  0xa0   : > { %p2504_p7 = por %p138_p13, %p3281_p8  ;;  %s1581_s1 = sshll.u32 %s435_s28, 3 }
  0xa1   : > { %s2509_s11 = sadd.s32 %s2321_s10, %s3351_s23  ;;  %s3283_s6 = sld [smem:[#allocation37_spill]] }
  0xa2   : > { %s3282_s4 = scalar_select %p2504_p7, 1, 0 }
  0xa3   : > { %s2512_s9 = scalar_select %p123_p4, %s2084_s15, %s125_s16  }
  0xa4   : > { %s1584_s25 = sshll.u32 %s2509_s11, 7  ;;  %s437_s0 = scalar_lea.vmem [#allocation7], %s1581_s1 }
  0xa5   : > { %s450_s22 = sshll.u32 %s437_s0, 4  ;;  %p3284_p5 = scmp.lt.s32.totalorder %s2128_s26, 4  ;;  %s2520_s22 = int_to_ptr.vmem [resolvable:$true] %s450_s22 }
  0xa6   : > { %s2528_s23 = sshll.u32 %s435_s28, 2  ;;  %s1593_s16 = sshll.u32 %s2509_s11, 6 }
  0xa7   : > { %s2518_s8 = scalar_lea.hbm %s3283_s6, %s1584_s25  ;;  %p2524_p9 = pnand %p3284_p5, %p134_p1 }
  0xa8   : > { %s1906_s12 = scalar_lea.hbm %s2518_s8, 128  ;;  %s1911_s13 = scalar_lea.hbm %s3283_s6, 4096 }
  0xa9   : > { %p1907_p12 = scmp.ne.s32.totalorder %s2518_s8, %s1906_s12  ;;  %p1908_p10 = pneg %p2524_p9 }
  0xaa   : > { %p1912_p11 = scmp.lt.u32.totalorder %s2518_s8, %s3283_s6  ;;  %p1913_p13 = scmp.lt.u32.totalorder %s1911_s13, %s1906_s12 }
  0xab   : > { %p1909_p3 = pnand %p1908_p10, %p1907_p12  ;;  %p1915_p1 = scmp.lt.u32.totalorder %s1906_s12, %s2518_s8 }
  0xac   : > { %p1914_p2 = por %p1913_p13, %p1912_p11 }
  0xad   : > { %p1910_p0 = pneg %p1909_p3 }
  0xae   : > { %p1916_p4 = por %p1915_p1, %p1914_p2 }
  0xb0   : > { %p1917_p8 = pnand %p1916_p4, %p1910_p0 }
  0xb2   : > { %1920 = shalt.err (!%p1917_p8)
}
  0xb3   : > { %s1921_s28 = scalar_lea.vmem %s2520_s22, 128  ;;  %s2135_s1 = smov [#allocation7]  }
  0xb4   : > { %p1922_p5 = scmp.ne.s32.totalorder %s2520_s22, %s1921_s28  ;;  %s1926_s25 = sshll.u32 %s2135_s1, 4  ;;  %s1927_s25 = int_to_ptr.vmem [resolvable:$false] %s1926_s25 }
  0xb5   : > { %s1928_s29 = scalar_lea.vmem %s1927_s25, 256  ;;  %p1929_p7 = scmp.lt.s32.totalorder %s2520_s22, %s1927_s25 }
  0xb6   : > { %p1924_p12 = pnand %p1922_p5, %p1908_p10  ;;  %p1930_p11 = scmp.lt.s32.totalorder %s1928_s29, %s1921_s28 }
  0xb8   : > { %p1925_p3 = pneg %p1924_p12  ;;  %p1931_p13 = por %p1930_p11, %p1929_p7 }
  0xba   : > { %p1932_p2 = pnand %p1931_p13, %p1925_p3 }
  0xbc   : > { %1935 = shalt.err (!%p1932_p2)
}
  0xbd   : > { %1650 = dma.hbm_to_vmem [thread:$0]  (!%p2524_p9), %s2518_s8, 128, %s2520_s22, %s2350_s2  }
  0xbe   : > { %s3286_s0 = sld [smem:[#allocation40_spill]]  ;;  %s498_s28 = scalar_lea.vmem [#allocation10], %s2528_s23 }
  0xbf   : > { %s511_s25 = sshll.u32 %s498_s28, 4  ;;  %s512_s25 = int_to_ptr.vmem [resolvable:$true] %s511_s25 }
  0xc4   : > { %s2562_s1 = scalar_lea.hbm %s3286_s0, %s1593_s16  ;;  %s1941_s8 = scalar_lea.hbm %s3286_s0, 2048 }
  0xc5   : > { %s1936_s29 = scalar_lea.hbm %s2562_s1, 64  ;;  %p1942_p4 = scmp.lt.u32.totalorder %s2562_s1, %s3286_s0 }
  0xc6   : > { %p1937_p7 = scmp.ne.s32.totalorder %s2562_s1, %s1936_s29  ;;  %p1943_p8 = scmp.lt.u32.totalorder %s1941_s8, %s1936_s29 }
  0xc7   : > { %p1945_p12 = scmp.lt.u32.totalorder %s1936_s29, %s2562_s1 }
  0xc8   : > { %p1939_p0 = pnand %p1937_p7, %p1908_p10  ;;  %p1944_p5 = por %p1943_p8, %p1942_p4 }
  0xca   : > { %p1940_p1 = pneg %p1939_p0  ;;  %p1946_p3 = por %p1945_p12, %p1944_p5 }
  0xcc   : > { %p1947_p11 = pnand %p1946_p3, %p1940_p1 }
  0xce   : > { %1950 = shalt.err (!%p1947_p11)
}
  0xcf   : > { %s1951_s23 = scalar_lea.vmem %s512_s25, 64  ;;  %s2136_s12 = smov [#allocation10]  }
  0xd0   : > { %p1952_p13 = scmp.ne.s32.totalorder %s512_s25, %s1951_s23  ;;  %s1956_s13 = sshll.u32 %s2136_s12, 4  ;;  %s1957_s13 = int_to_ptr.vmem [resolvable:$false] %s1956_s13 }
  0xd1   : > { %s1958_s28 = scalar_lea.vmem %s1957_s13, 128  ;;  %p1959_p0 = scmp.lt.s32.totalorder %s512_s25, %s1957_s13 }
  0xd2   : > { %p1954_p2 = pnand %p1952_p13, %p1908_p10  ;;  %p1960_p6 = scmp.lt.s32.totalorder %s1958_s28, %s1951_s23 }
  0xd4   : > { %p1955_p7 = pneg %p1954_p2  ;;  %p1961_p4 = por %p1960_p6, %p1959_p0 }
  0xd6   : > { %p1962_p8 = pnand %p1961_p4, %p1955_p7 }
  0xd8   : > { %1965 = shalt.err (!%p1962_p8)
}
  0xd9   : > { %1656 = dma.hbm_to_vmem [thread:$0]  (!%p2524_p9), %s2562_s1, 64, %s512_s25, %s2395_s5  }
  0xda   : > { %p3287_p1 = scmp.ne.s32.totalorder %s3266_s17, 0 }
  0xdc   : > { %520 = sbr.rel (%p3287_p1) target bundleno = 619 (0x26b), region = 60 }
  0xe3   : > { %s2588_s29 = sand.u32 1, %s2104_s20   ;;  %p3288_p6 = scmp.ne.s32.totalorder %s3272_s30, 0 }
  0xe4   : > { %s3229_s2 = sshll.u32 %s2588_s29, 6  ;;  %s523_s11 = scalar_lea.sflag [#allocation3], %s2588_s29 }
  0xe5   : > { %s2594_s8 = scalar_lea.vmem [#allocation2], %s3229_s2 }
  0xe6   : > { %2051 = dma.done.wait (%p3288_p6), %s523_s11, 1024  }
  0xe7   : > { %2053 = vsyncadd (%p3288_p6), %s523_s11, 4294966272  ;;  %s3289_s17 = sld [smem:[#allocation18_spill]]  ;;  %s3290_s5 = sld [smem:[#allocation26_spill]] }
  0xe8   : > { %s531_s10 = sand.u32 1, %s2269_s27  }
  0xe9   : > { %s532_s22 = scalar_lea.sflag [#allocation6], %s531_s10 }
  0xed   : > { %s533_s1 = sand.u32 1, %s3289_s17   ;;  %p3291_p9 = scmp.ne.s32.totalorder %s3290_s5, 0 }
  0xee   : > { %s2602_s25 = sshll.u32 %s533_s1, 3 }
  0xef   : > { %2055 = dma.done.wait (%p3291_p9), %s532_s22, 128  }
  0xf0   : > { %2057 = vsyncadd (%p3291_p9), %s532_s22, 4294967168  ;;  %s542_s23 = sand.u32 1, %s2080_s14   ;;  %p3292_p10 = scmp.ne.s32.totalorder %s3282_s4, 0 }
  0xf1   : > { %s2610_s30 = sshll.u32 %s542_s23, 3 }
  0xf2   : > { %2059 = dma.done.wait (%p3292_p10), %s532_s22, 128  }
  0xf3   : > { %2061 = vsyncadd (%p3292_p10), %s532_s22, 4294967168  ;;  %s2617_s27 = sshll.u32 %s533_s1, 2  ;;  %s550_s13 = scalar_lea.sflag [#allocation9], %s531_s10 }
  0xf4   : > { %2063 = dma.done.wait (%p3291_p9), %s550_s13, 64  }
  0xf5   : > { %2065 = vsyncadd (%p3291_p9), %s550_s13, 4294967232  ;;  %s2624_s11 = sshll.u32 %s542_s23, 2 }
  0xf6   : > { %2067 = dma.done.wait (%p3292_p10), %s550_s13, 64  }
  0xf7   : > { %2069 = vsyncadd (%p3292_p10), %s550_s13, 4294967232  ;;  %v2137_v0 = vmov 0   ;;  %s3293_s22 = sld [smem:[#allocation41_spill]]  ;;  %s3295_s10 = sld [smem:[#allocation43_spill]]  ;;  %v692_v15 = vlaneseq  ;;  %vm1027_vm0 = vcmask 7168   ;;  %vm1068_vm1 = vcmask 121856  }
  0xf8   : > { %1783 = vset.pattern.permute.xlu1 %v2137_v0  ;;  %1782 = vset.pattern.permute.xlu0 %v2137_v0  ;;  %s3296_s16 = sld [smem:[#allocation42_spill]]  ;;  %s3297_s28 = sld [smem:[#allocation19_spill]]  ;;  %vm1329_vm2 = vcmask 130048  }
  0xf9   : > { %s3298_s4 = sld [smem:[#allocation20_spill]]  ;;  %v693_v16 = vshrl.u32 %v692_v15, 7  ;;  %s3299_s6 = sld [smem:[#allocation38_spill]] }
  0xfa   : > { %s3303_s13 = scalar_lea.vmem [#allocation10], %s2624_s11  ;;  %p3321_p2 = scmp.ne.s32.totalorder %s3273_s7, 0 }
  0xfb   : > { %v2683_v17 = vsub.s32 0, %v693_v16  ;;  %v2687_v19 = vsub.s32 1, %v693_v16  ;;  %v2689_v20 = vsub.s32 2, %v693_v16  ;;  %v2691_v21 = vsub.s32 3, %v693_v16 }
  0xfd   : > { %s3294_s2 = smov %s3293_s22  ;;  %v1613_v1 = vld [vmem:[%s3293_s22 + $0x10] sm:$0xff]  ;;  %v658_v5 = vld [vmem:[%s3295_s10] sm:$0xff]  ;;  %v1606_v7 = vld [vmem:[%s3295_s10 + $0x18] sm:$0xff] }
  0xfe   : > { %v685_v2 = vld [vmem:[%s3294_s2] sm:$0xff]  ;;  %854 = vperm.xlu1 %1783, %v1613_v1   ;;  %v1614_v3 = vld [vmem:[%s3294_s2 + $0x18] sm:$0xff]  ;;  %v1612_v4 = vld [vmem:[%s3294_s2 + $0x8] sm:$0xff]  ;;  %s2674_s1 = sshll.u32 %s3297_s28, 3  ;;  %p960_p3 = scmp.lt.s32.totalorder %s3297_s28, 1 }
  0xff   : > { %734 = vperm.xlu0 %1782, %v685_v2   ;;  %v656_v6 = vld [vmem:[%s3296_s16] sm:$0xff]  ;;  %v1604_v8 = vld [vmem:[%s3295_s10 + $0x8] sm:$0xff]  ;;  %v1605_v9 = vld [vmem:[%s3295_s10 + $0x10] sm:$0xff]  ;;  %p638_p5 = scmp.lt.s32.totalorder %s3298_s4, 1  ;;  %p640_p12 = scmp.lt.s32.totalorder %s2674_s1, 15 }
 0x100   : > { %v1607_v10 = vld [vmem:[%s3295_s10 + $0x20] sm:$0xff]  ;;  %v1609_v11 = vld [vmem:[%s3295_s10 + $0x30] sm:$0xff]  ;;  %v1608_v12 = vld [vmem:[%s3295_s10 + $0x28] sm:$0xff]  ;;  %p957_p11 = scmp.gt.s32.totalorder %s3297_s28, 0  ;;  %s1625_s23 = sshll.u32 %s3298_s4, 4 }
 0x101   : > { %v1611_v13 = vld [vmem:[%s3295_s10 + $0x40] sm:$0xff]  ;;  %v1610_v14 = vld [vmem:[%s3295_s10 + $0x38] sm:$0xff]  ;;  %s639_s22 = scalar_select %p638_p5, %s3298_s4, 1 }
 0x102   : > { %919 = vperm.xlu1 %1783, %v1614_v3   ;;  %s641_s0 = scalar_select %p640_p12, %s2674_s1, 15 }
 0x103   : > { %789 = vperm.xlu0 %1782, %v1612_v4   ;;  %s1602_s16 = sshll.u32 %s639_s22, 4  ;;  %s3304_s22 = scalar_lea.vmem [#allocation8], %s2617_s27 }
 0x104   : > { %s643_s5 = sadd.s32 %s1602_s16, %s641_s0  ;;  %s3309_s0 = scalar_lea.vmem [#allocation7], %s2610_s30 }
 0x105   : > { %s1603_s12 = sshll.u32 %s643_s5, 2  ;;  %s3310_s5 = scalar_lea.vmem [#allocation5], %s2602_s25 }
 0x106   : > { %1081 = vperm.xlu1 %1783, %v658_v5   ;;  %s645_s2 = scalar_lea.vmem %s3299_s6, %s1603_s12  ;;  %s2138_s6 = smov 1  }
 0x107   : > { %944 = vperm.xlu0 %1782, %v656_v6   ;;  %v2685_v18 = vld [vmem:[%s645_s2 + $0x4] sm:$0xf]  ;;  %v676_v22 = vld [vmem:[%s645_s2] sm:$0xf]  ;;  %v2693_v23 = vld [vmem:[%s645_s2 + $0xc] sm:$0xf]  ;;  %s1351_s17 = sadd.s32 %s1625_s23, %s2674_s1 }
 0x108   : > { %v703_v24 = vrot.slane %v2685_v18, %v2683_v17  ;;  %v2697_v25 = vld [vmem:[%s645_s2 + $0x8] sm:$0xf]  ;;  %v758_v26 = vrot.slane %v2685_v18, %v2687_v19  ;;  %v823_v27 = vrot.slane %v2685_v18, %v2689_v20  ;;  %v888_v28 = vrot.slane %v2685_v18, %v2691_v21  ;;  %v2706_v30 = vld [vmem:[%s645_s2 + $0x14] sm:$0xf]  ;;  %v2713_v35 = vld [vmem:[%s645_s2 + $0x10] sm:$0xf] }
 0x109   : > { %v699_v29 = vrot.slane %v676_v22, %v2683_v17  ;;  %v754_v31 = vrot.slane %v676_v22, %v2687_v19  ;;  %v819_v32 = vrot.slane %v676_v22, %v2689_v20  ;;  %v884_v33 = vrot.slane %v676_v22, %v2691_v21  ;;  %v2723_v40 = vld [vmem:[%s645_s2 + $0x1c] sm:$0xf]  ;;  %v2733_v45 = vld [vmem:[%s645_s2 + $0x18] sm:$0xf]  ;;  %s961_s27 = scalar_select %p960_p3, 1, 0 }
 0x10a   : > { %1136 = vperm.xlu1 %1783, %v1606_v7   ;;  %v711_v34 = vrot.slane %v2693_v23, %v2683_v17  ;;  %v766_v36 = vrot.slane %v2693_v23, %v2687_v19  ;;  %v831_v37 = vrot.slane %v2693_v23, %v2689_v20  ;;  %v896_v38 = vrot.slane %v2693_v23, %v2691_v21  ;;  %s958_s11 = scalar_select %p957_p11, 1, 0 }
 0x10b   : > { %1094 = vperm.xlu0 %1782, %v1604_v8   ;;  %v707_v39 = vrot.slane %v2697_v25, %v2683_v17  ;;  %v762_v41 = vrot.slane %v2697_v25, %v2687_v19  ;;  %v827_v42 = vrot.slane %v2697_v25, %v2689_v20  ;;  %v892_v43 = vrot.slane %v2697_v25, %v2691_v21  ;;  %s962_s28 = scvt.s32.f32 %s961_s27  ;;  %s3311_s12 = sld [smem:[#allocation44_spill]] }
 0x10c   : > { %v719_v44 = vrot.slane %v2706_v30, %v2683_v17  ;;  %v774_v46 = vrot.slane %v2706_v30, %v2687_v19  ;;  %v839_v47 = vrot.slane %v2706_v30, %v2689_v20  ;;  %v904_v48 = vrot.slane %v2706_v30, %v2691_v21  ;;  %s959_s16 = scvt.s32.f32 %s958_s11  ;;  %s1626_s2 = sshll.u32 %s1351_s17, 7 }
 0x10d   : > { %v715_v49 = vrot.slane %v2713_v35, %v2683_v17  ;;  %v770_v50 = vrot.slane %v2713_v35, %v2687_v19  ;;  %v835_v51 = vrot.slane %v2713_v35, %v2689_v20  ;;  %v900_v52 = vrot.slane %v2713_v35, %v2691_v21  ;;  %s1339_s11 = scalar_lea.sflag [#allocation4], %s2588_s29 }
 0x10e   : > { %1115 = vperm.xlu1 %1783, %v1605_v9   ;;  %v727_v53 = vrot.slane %v2723_v40, %v2683_v17  ;;  %v782_v56 = vrot.slane %v2723_v40, %v2687_v19  ;;  %v847_v57 = vrot.slane %v2723_v40, %v2689_v20  ;;  %v912_v58 = vrot.slane %v2723_v40, %v2691_v21  ;;  %v675_v40 = vld [vmem:[%s3304_s22] sm:$0xf] }
 0x10f   : > { %1149 = vperm.xlu0 %1782, %v1607_v10   ;;  %v723_v59 = vrot.slane %v2733_v45, %v2683_v17  ;;  %v778_v61 = vrot.slane %v2733_v45, %v2687_v19  ;;  %v843_v62 = vrot.slane %v2733_v45, %v2689_v20  ;;  %v908_v63 = vrot.slane %v2733_v45, %v2691_v21  ;;  %v2856_v45 = vld [vmem:[%s2594_s8 + $0x28] sm:$0xff] }
 0x110   : > { %3305 = vst [vmem:[#allocation31_spill] sm:$0xff] %v2856_v45 }
 0x112   : > { %1199 = vperm.xlu1 %1783, %v1609_v11  }
 0x113   : > { %1170 = vperm.xlu0 %1782, %v1608_v12  }
 0x116   : > { %1233 = vperm.xlu1 %1783, %v1611_v13  }
 0x117   : > { %1212 = vperm.xlu0 %1782, %v1610_v14  }
 0x17d   : > { %v2751_v54 = vpop.permute.xlu1 %854 }
 0x17e   : > { %v2753_v55 = vpop.permute.xlu0 %734  ;;  %v859_v0 = vmul.f32 %v2751_v54, %v823_v27  ;;  %v858_v2 = vmul.f32 %v2751_v54, %v819_v32  ;;  %v861_v4 = vmul.f32 %v2751_v54, %v831_v37  ;;  %v860_v6 = vmul.f32 %v2751_v54, %v827_v42 }
 0x17f   : > { %v739_v60 = vmul.f32 %v2753_v55, %v703_v24  ;;  %v738_v1 = vmul.f32 %v2753_v55, %v699_v29  ;;  %v741_v3 = vmul.f32 %v2753_v55, %v711_v34  ;;  %v740_v5 = vmul.f32 %v2753_v55, %v707_v39 }
 0x180   : > { %v743_v7 = vmul.f32 %v2753_v55, %v719_v44  ;;  %v863_v10 = vmul.f32 %v2751_v54, %v839_v47  ;;  %v742_v11 = vmul.f32 %v2753_v55, %v715_v49  ;;  %v862_v12 = vmul.f32 %v2751_v54, %v835_v51 }
 0x181   : > { %v2778_v8 = vpop.permute.xlu1 %919  ;;  %v745_v13 = vmul.f32 %v2753_v55, %v727_v53  ;;  %v865_v16 = vmul.f32 %v2751_v54, %v847_v57  ;;  %v744_v18 = vmul.f32 %v2753_v55, %v723_v59  ;;  %v2806_v57 = vld [vmem:[%s2594_s8] sm:$0xff] }
 0x182   : > { %v2780_v9 = vpop.permute.xlu0 %789  ;;  %v924_v22 = vmul.f32 %v2778_v8, %v888_v28  ;;  %v923_v23 = vmul.f32 %v2778_v8, %v884_v33  ;;  %v926_v30 = vmul.f32 %v2778_v8, %v896_v38  ;;  %v925_v34 = vmul.f32 %v2778_v8, %v892_v43  ;;  %v2803_v43 = vld [vmem:[%s2594_s8 + $0x8] sm:$0xff] }
 0x183   : > { %v794_v14 = vmul.f32 %v2780_v9, %v758_v26  ;;  %v793_v15 = vmul.f32 %v2780_v9, %v754_v31  ;;  %v796_v24 = vmul.f32 %v2780_v9, %v766_v36  ;;  %v795_v25 = vmul.f32 %v2780_v9, %v762_v41  ;;  %3300 = vst [vmem:[#allocation28_spill] sm:$0xff] %v2803_v43 }
 0x184   : > { %v798_v26 = vmul.f32 %v2780_v9, %v774_v46  ;;  %v797_v28 = vmul.f32 %v2780_v9, %v770_v50  ;;  %v800_v36 = vmul.f32 %v2780_v9, %v782_v56  ;;  %v928_v44 = vmul.f32 %v2778_v8, %v904_v48 }
 0x185   : > { %v804_v27 = vadd.f32 %v794_v14, %v739_v60  ;;  %v803_v29 = vadd.f32 %v793_v15, %v738_v1  ;;  %v806_v32 = vadd.f32 %v796_v24, %v741_v3  ;;  %v805_v31 = vadd.f32 %v795_v25, %v740_v5  ;;  %v684_v14 = vld [vmem:[%s3303_s13] sm:$0xf]  ;;  %v2860_v25 = vld [vmem:[%s2594_s8 + $0x20] sm:$0xff] }
 0x186   : > { %v808_v39 = vadd.f32 %v798_v26, %v743_v7  ;;  %v807_v38 = vadd.f32 %v797_v28, %v742_v11  ;;  %v810_v51 = vadd.f32 %v800_v36, %v745_v13  ;;  %v2800_v53 = vpop.permute.xlu0 %944  ;;  %v799_v60 = vmul.f32 %v2780_v9, %v778_v61  ;;  %v2825_v11 = vld [vmem:[%s2594_s8 + $0x18] sm:$0xff]  ;;  %3306 = vst [vmem:[#allocation32_spill] sm:$0xff] %v2860_v25 }
 0x187   : > { %v869_v37 = vadd.f32 %v859_v0, %v804_v27  ;;  %v868_v33 = vadd.f32 %v858_v2, %v803_v29  ;;  %v871_v41 = vadd.f32 %v861_v4, %v806_v32  ;;  %v870_v42 = vadd.f32 %v860_v6, %v805_v31  ;;  %3301 = vst [vmem:[#allocation29_spill] sm:$0xff] %v2825_v11  ;;  %v2879_v28 = vld [vmem:[%s2594_s8 + $0x38] sm:$0xff] }
 0x188   : > { %v873_v49 = vadd.f32 %v863_v10, %v808_v39  ;;  %v872_v56 = vadd.f32 %v862_v12, %v807_v38  ;;  %v927_v1 = vmul.f32 %v2778_v8, %v900_v52  ;;  %v864_v2 = vmul.f32 %v2751_v54, %v843_v62  ;;  %v2828_v52 = vld [vmem:[%s2594_s8 + $0x10] sm:$0xff]  ;;  %3307 = vst [vmem:[#allocation33_spill] sm:$0xff] %v2879_v28 }
 0x189   : > { %v934_v47 = vadd.f32 %v924_v22, %v869_v37  ;;  %v933_v46 = vadd.f32 %v923_v23, %v868_v33  ;;  %v936_v50 = vadd.f32 %v926_v30, %v871_v41  ;;  %v935_v59 = vadd.f32 %v925_v34, %v870_v42  ;;  %3302 = vst [vmem:[#allocation30_spill] sm:$0xff] %v2828_v52  ;;  %v2882_v37 = vld [vmem:[%s2594_s8 + $0x30] sm:$0xff]  ;;  %s2139_s8 = smov 127  }
 0x18a   : > { %v938_v4 = vadd.f32 %v928_v44, %v873_v49  ;;  %v875_v5 = vadd.f32 %v865_v16, %v810_v51  ;;  %v809_v6 = vadd.f32 %v799_v60, %v744_v18  ;;  %v937_v35 = vadd.f32 %v927_v1, %v872_v56  ;;  %3308 = vst [vmem:[#allocation34_spill] sm:$0xff] %v2882_v37  ;;  %v983_v60 = vld [vmem:[%s3309_s0] sm:$0xff]  ;;  %s2140_s0 = smov [#allocation11]  }
 0x18b   : > { %v949_v48 = vadd.f32 %v2800_v53, %v934_v47  ;;  %v948_v0 = vadd.f32 %v2800_v53, %v933_v46  ;;  %v951_v3 = vadd.f32 %v2800_v53, %v936_v50  ;;  %v950_v10 = vadd.f32 %v2800_v53, %v935_v59 }
 0x18c   : > { %v930_v62 = vmul.f32 %v2778_v8, %v912_v58  ;;  %v874_v12 = vadd.f32 %v864_v2, %v809_v6  ;;  %v929_v13 = vmul.f32 %v2778_v8, %v908_v63  ;;  %v953_v58 = vadd.f32 %v2800_v53, %v938_v4  ;;  %v657_v4 = vld [vmem:[%s3311_s12] sm:$0xff] }
 0x18d   : > { %v2818_v61 = vadd.f32 %v2803_v43, %v949_v48  ;;  %v2821_v7 = vadd.f32 %v2806_v57, %v948_v0  ;;  %v786_v16 = vrot.slane %v684_v14, %v2687_v19  ;;  %v750_v18 = vrot.slane %v675_v40, %v2687_v19  ;;  %v963_v48 = vld [vmem:[%s3310_s5] sm:$0xff] }
 0x18e   : > { %v940_v15 = vadd.f32 %v930_v62, %v875_v5  ;;  %v2850_v22 = vadd.f32 %v2825_v11, %v951_v3  ;;  %v2853_v23 = vadd.f32 %v2828_v52, %v950_v10  ;;  %v952_v63 = vadd.f32 %v2800_v53, %v937_v35  ;;  %v2937_v5 = vpop.permute.xlu1 %1081  ;;  %v2941_v10 = vpop.permute.xlu0 %1094 }
 0x18f   : > { %1001 = vrot.lane.b32.xlu0 %v2818_v61, %s2138_s6  ;;  %999 = vrot.lane.b32.xlu1 %v2821_v7, %s2138_s6  ;;  %v939_v24 = vadd.f32 %v929_v13, %v874_v12  ;;  %v731_v19 = vrot.slane %v684_v14, %v2683_v17  ;;  %v695_v27 = vrot.slane %v675_v40, %v2683_v17  ;;  %v985_v1 = vstv %s962_s28 }
 0x190   : > { %v2869_v29 = vadd.f32 %v2856_v45, %v953_v58  ;;  %v955_v30 = vadd.f32 %v2800_v53, %v940_v15  ;;  %v2873_v26 = vadd.f32 %v2860_v25, %v952_v63  ;;  %v801_v31 = vmul.f32 %v2780_v9, %v786_v16 }
 0x191   : > { %v954_v32 = vadd.f32 %v2800_v53, %v939_v24  ;;  %v792_v34 = vmul.f32 %v2780_v9, %v750_v18  ;;  %v851_v17 = vrot.slane %v684_v14, %v2689_v20  ;;  %v746_v33 = vmul.f32 %v2753_v55, %v731_v19 }
 0x192   : > { %v737_v39 = vmul.f32 %v2753_v55, %v695_v27  ;;  %v815_v9 = vrot.slane %v675_v40, %v2689_v20  ;;  %v2893_v36 = vadd.f32 %v2879_v28, %v955_v30  ;;  %v916_v38 = vrot.slane %v684_v14, %v2691_v21  ;;  %v2939_v6 = vpop.permute.xlu1 %1136  ;;  %v1150_v62 = vpop.permute.xlu0 %1149 }
 0x193   : > { %1005 = vrot.lane.b32.xlu0 %v2850_v22, %s2138_s6  ;;  %1003 = vrot.lane.b32.xlu1 %v2853_v23, %s2138_s6  ;;  %v2896_v41 = vadd.f32 %v2882_v37, %v954_v32  ;;  %v811_v42 = vadd.f32 %v801_v31, %v746_v33  ;;  %v866_v55 = vmul.f32 %v2751_v54, %v851_v17  ;;  %v965_v2 = vstv %s959_s16  ;;  %s1970_s16 = sshll.u32 %s2140_s0, 4  ;;  %s1971_s16 = int_to_ptr.vmem [resolvable:$false] %s1970_s16 }
 0x194   : > { %v802_v44 = vadd.f32 %v792_v34, %v737_v39  ;;  %v857_v20 = vmul.f32 %v2751_v54, %v815_v9  ;;  %v880_v47 = vrot.slane %v675_v40, %v2691_v21  ;;  %v931_v51 = vmul.f32 %v2778_v8, %v916_v38  ;;  %s1972_s5 = scalar_lea.vmem %s1971_s16, 2048 }
 0x195   : > { %v876_v46 = vadd.f32 %v866_v55, %v811_v42  ;;  %v1098_v16 = vmul.f32 %v2941_v10, %v2821_v7  ;;  %v2956_v18 = vmul.f32 %v1150_v62, %v2821_v7  ;;  %v1099_v63 = vmul.f32 %v2941_v10, %v2818_v61 }
 0x196   : > { %v867_v49 = vadd.f32 %v857_v20, %v802_v44  ;;  %v922_v50 = vmul.f32 %v2778_v8, %v880_v47  ;;  %v2943_v35 = vpop.permute.xlu1 %1115  ;;  %v2947_v13 = vpop.permute.xlu0 %1170  ;;  %v1153_v24 = vmul.f32 %v1150_v62, %v2818_v61  ;;  %v1100_v27 = vmul.f32 %v2941_v10, %v2853_v23 }
 0x197   : > { %1009 = vrot.lane.b32.xlu0 %v2869_v29, %s2138_s6  ;;  %1007 = vrot.lane.b32.xlu1 %v2873_v26, %s2138_s6  ;;  %v941_v59 = vadd.f32 %v931_v51, %v876_v46  ;;  %v1154_v30 = vmul.f32 %v1150_v62, %v2853_v23  ;;  %v1101_v32 = vmul.f32 %v2941_v10, %v2850_v22 }
 0x198   : > { %v932_v54 = vadd.f32 %v922_v50, %v867_v49  ;;  %v1155_v31 = vmul.f32 %v1150_v62, %v2850_v22  ;;  %v1102_v39 = vmul.f32 %v2941_v10, %v2873_v26  ;;  %v1156_v44 = vmul.f32 %v1150_v62, %v2873_v26 }
 0x199   : > { %v956_v21 = vadd.f32 %v2800_v53, %v941_v59  ;;  %v1103_v55 = vmul.f32 %v2941_v10, %v2869_v29  ;;  %v1157_v20 = vmul.f32 %v1150_v62, %v2869_v29  ;;  %v1104_v47 = vmul.f32 %v2941_v10, %v2896_v41 }
 0x19a   : > { %v947_v56 = vadd.f32 %v2800_v53, %v932_v54  ;;  %v2945_v12 = vpop.permute.xlu1 %1199  ;;  %v2951_v40 = vpop.permute.xlu0 %1212  ;;  %v1158_v50 = vmul.f32 %v1150_v62, %v2896_v41 }
 0x19b   : > { %1013 = vrot.lane.b32.xlu0 %v2893_v36, %s2138_s6  ;;  %1011 = vrot.lane.b32.xlu1 %v2896_v41, %s2138_s6  ;;  %v984_v8 = vadd.f32 %v983_v60, %v956_v21  ;;  %v1216_v33 = vmul.f32 %v2951_v40, %v2853_v23  ;;  %v1217_v42 = vmul.f32 %v2951_v40, %v2850_v22 }
 0x19c   : > { %v964_v0 = vadd.f32 %v963_v48, %v947_v56  ;;  %v1218_v38 = vmul.f32 %v2951_v40, %v2873_v26  ;;  %v1220_v60 = vmul.f32 %v2951_v40, %v2896_v41  ;;  %v3002_v48 = vmul.f32 %v1150_v62, %v2893_v36 }
 0x19d   : > { %v2924_v3 = vmul.f32 %v985_v1, %v984_v8  ;;  %v3006_v8 = vmul.f32 %v2951_v40, %v2893_v36 }
 0x19e   : > { %v2926_v53 = vmul.f32 %v965_v2, %v964_v0  ;;  %v2949_v14 = vpop.permute.xlu1 %1233 }
 0x19f   : > { %1042 = vrot.lane.b32.xlu0 %v2818_v61, %s2139_s8  ;;  %1040 = vrot.lane.b32.xlu1 %v2821_v7, %s2139_s8 }
 0x1a3   : > { %1046 = vrot.lane.b32.xlu0 %v2850_v22, %s2139_s8  ;;  %1044 = vrot.lane.b32.xlu1 %v2853_v23, %s2139_s8  ;;  %v1219_v23 = vmul.f32 %v2951_v40, %v2869_v29 }
 0x1a7   : > { %1050 = vrot.lane.b32.xlu0 %v2869_v29, %s2139_s8  ;;  %1048 = vrot.lane.b32.xlu1 %v2873_v26, %s2139_s8 }
 0x1ab   : > { %1054 = vrot.lane.b32.xlu0 %v2893_v36, %s2139_s8  ;;  %1052 = vrot.lane.b32.xlu1 %v2896_v41, %s2139_s8 }
 0x1af   : > { %1015 = vrot.lane.b32.xlu1 %v2924_v3, %s2138_s6  ;;  %997 = vrot.lane.b32.xlu0 %v2926_v53, %s2138_s6  ;;  %s3314_s6 = sshll.u32 %s2588_s29, 6 }
 0x1b0   : > { %s627_s13 = scalar_lea.vmem [#allocation11], %s3314_s6 }
 0x1b1   : > { %s1354_s4 = sshll.u32 %s627_s13, 4  ;;  %s3114_s4 = int_to_ptr.vmem [resolvable:$true] %s1354_s4 }
 0x1b2   : > { %s1966_s28 = scalar_lea.vmem %s3114_s4, 1024  ;;  %p1973_p4 = scmp.lt.s32.totalorder %s3114_s4, %s1971_s16 }
 0x1b3   : > { %1056 = vrot.lane.b32.xlu1 %v2924_v3, %s2139_s8  ;;  %1038 = vrot.lane.b32.xlu0 %v2926_v53, %s2139_s8  ;;  %s3317_s8 = sld [smem:[#allocation45_spill]]  ;;  %p1967_p13 = scmp.ne.s32.totalorder %s3114_s4, %s1966_s28 }
 0x1b4   : > { %p1974_p8 = scmp.lt.s32.totalorder %s1972_s5, %s1966_s28 }
 0x1b5   : > { %p1968_p7 = pnand %p1967_p13, %p3321_p2 }
 0x1b6   : > { %p1975_p1 = por %p1974_p8, %p1973_p4 }
 0x1b7   : > { %1262 = vperm.xlu0 %1782, %v657_v4   ;;  %p1969_p0 = pneg %p1968_p7 }
 0x1b9   : > { %s3108_s27 = scalar_lea.hbm %s3317_s8, %s1626_s2  ;;  %p1976_p6 = pnand %p1975_p1, %p1969_p0 }
 0x201   : > { %v1000_v58 = vpop.permute.xlu1 %999  ;;  %v1002_v15 = vpop.permute.xlu0 %1001 }
 0x202   : > { %v1029_v7 = vsel %vm1027_vm0, 0.0, %v1000_v58  ;;  %v2969_v17 = vsel %vm1027_vm0, 0.0, %v1002_v15 }
 0x203   : > { %v1085_v46 = vmul.f32 %v2937_v5, %v1029_v7  ;;  %v1086_v22 = vmul.f32 %v2937_v5, %v2969_v17  ;;  %v1140_v59 = vmul.f32 %v2939_v6, %v2969_v17  ;;  %v3009_v0 = vmul.f32 %v2939_v6, %v1029_v7 }
 0x205   : > { %v1004_v19 = vpop.permute.xlu1 %1003  ;;  %v1006_v34 = vpop.permute.xlu0 %1005  ;;  %v1106_v58 = vadd.f32 %v1098_v16, %v1085_v46  ;;  %v1107_v36 = vadd.f32 %v1099_v63, %v1086_v22 }
 0x206   : > { %v1031_v9 = vsel %vm1027_vm0, 0.0, %v1004_v19  ;;  %v1032_v49 = vsel %vm1027_vm0, 0.0, %v1006_v34 }
 0x207   : > { %v1087_v54 = vmul.f32 %v2937_v5, %v1031_v9  ;;  %v1141_v29 = vmul.f32 %v2939_v6, %v1031_v9  ;;  %v1203_v56 = vmul.f32 %v2945_v12, %v1031_v9  ;;  %v1088_v1 = vmul.f32 %v2937_v5, %v1032_v49 }
 0x208   : > { %v1142_v2 = vmul.f32 %v2939_v6, %v1032_v49  ;;  %v1204_v15 = vmul.f32 %v2945_v12, %v1032_v49  ;;  %v1161_v9 = vadd.f32 %v1153_v24, %v1140_v59 }
 0x209   : > { %v1008_v26 = vpop.permute.xlu1 %1007  ;;  %v1010_v51 = vpop.permute.xlu0 %1009  ;;  %v1162_v7 = vadd.f32 %v1154_v30, %v1141_v29  ;;  %v1224_v28 = vadd.f32 %v1216_v33, %v1203_v56  ;;  %v1109_v16 = vadd.f32 %v1101_v32, %v1088_v1 }
 0x20a   : > { %v1033_v21 = vsel %vm1027_vm0, 0.0, %v1008_v26  ;;  %v1034_v4 = vsel %vm1027_vm0, 0.0, %v1010_v51  ;;  %v1108_v26 = vadd.f32 %v1100_v27, %v1087_v54  ;;  %v1163_v46 = vadd.f32 %v1155_v31, %v1142_v2 }
 0x20b   : > { %v1089_v41 = vmul.f32 %v2937_v5, %v1033_v21  ;;  %v1143_v62 = vmul.f32 %v2939_v6, %v1033_v21  ;;  %v1205_v37 = vmul.f32 %v2945_v12, %v1033_v21  ;;  %v1090_v45 = vmul.f32 %v2937_v5, %v1034_v4 }
 0x20c   : > { %v1144_v49 = vmul.f32 %v2939_v6, %v1034_v4  ;;  %v1206_v25 = vmul.f32 %v2945_v12, %v1034_v4  ;;  %v1225_v11 = vadd.f32 %v1217_v42, %v1204_v15 }
 0x20d   : > { %v1012_v19 = vpop.permute.xlu1 %1011  ;;  %v1014_v34 = vpop.permute.xlu0 %1013  ;;  %v1110_v52 = vadd.f32 %v1102_v39, %v1089_v41  ;;  %v1164_v43 = vadd.f32 %v1156_v44, %v1143_v62  ;;  %v1226_v31 = vadd.f32 %v1218_v38, %v1205_v37  ;;  %v1111_v59 = vadd.f32 %v1103_v55, %v1090_v45 }
 0x20e   : > { %v1035_v51 = vsel %vm1027_vm0, 0.0, %v1012_v19  ;;  %v1036_v63 = vsel %vm1027_vm0, 0.0, %v1014_v34  ;;  %v1165_v44 = vadd.f32 %v1157_v20, %v1144_v49  ;;  %v1227_v54 = vadd.f32 %v1219_v23, %v1206_v25 }
 0x20f   : > { %v1091_v30 = vmul.f32 %v2937_v5, %v1035_v51  ;;  %v1145_v33 = vmul.f32 %v2939_v6, %v1035_v51  ;;  %v1207_v29 = vmul.f32 %v2945_v12, %v1035_v51  ;;  %v1146_v21 = vmul.f32 %v2939_v6, %v1036_v63 }
 0x210   : > { %v1208_v56 = vmul.f32 %v2945_v12, %v1036_v63 }
 0x211   : > { %v1041_v24 = vpop.permute.xlu1 %1040  ;;  %v1043_v27 = vpop.permute.xlu0 %1042  ;;  %v1112_v55 = vadd.f32 %v1104_v47, %v1091_v30  ;;  %v1166_v4 = vadd.f32 %v1158_v50, %v1145_v33 }
 0x212   : > { %v3026_v22 = vsel %vm1068_vm1, %v1041_v24, 0.0  ;;  %v3029_v32 = vsel %vm1068_vm1, %v1043_v27, 0.0  ;;  %v1167_v24 = vadd.f32 %v3002_v48, %v1146_v21 }
 0x213   : > { %v1119_v39 = vmul.f32 %v2943_v35, %v3026_v22  ;;  %v1174_v42 = vmul.f32 %v2947_v13, %v3029_v32  ;;  %v1120_v2 = vmul.f32 %v2943_v35, %v3029_v32 }
 0x215   : > { %v1127_v1 = vadd.f32 %v1119_v39, %v1106_v58  ;;  %v1182_v37 = vadd.f32 %v1174_v42, %v1161_v9  ;;  %v1045_v45 = vpop.permute.xlu1 %1044  ;;  %v1047_v38 = vpop.permute.xlu0 %1046  ;;  %v1228_v58 = vadd.f32 %v1220_v60, %v1207_v29  ;;  %v1128_v47 = vadd.f32 %v1120_v2, %v1107_v36 }
 0x216   : > { %v1072_v15 = vsel %vm1068_vm1, %v1045_v45, 0.0  ;;  %v1073_v20 = vsel %vm1068_vm1, %v1047_v38, 0.0 }
 0x217   : > { %v1190_v25 = vadd.f32 %v1182_v37, %v1127_v1  ;;  %v1121_v23 = vmul.f32 %v2943_v35, %v1072_v15  ;;  %v1175_v6 = vmul.f32 %v2947_v13, %v1072_v15  ;;  %v1237_v41 = vmul.f32 %v2949_v14, %v1072_v15 }
 0x218   : > { %v1122_v62 = vmul.f32 %v2943_v35, %v1073_v20  ;;  %v1176_v19 = vmul.f32 %v2947_v13, %v1073_v20  ;;  %v1238_v34 = vmul.f32 %v2949_v14, %v1073_v20  ;;  %v1229_v15 = vadd.f32 %v3006_v8, %v1208_v56 }
 0x219   : > { %v1129_v50 = vadd.f32 %v1121_v23, %v1108_v26  ;;  %v1183_v9 = vadd.f32 %v1175_v6, %v1162_v7  ;;  %v1245_v51 = vadd.f32 %v1237_v41, %v1224_v28  ;;  %v1049_v49 = vpop.permute.xlu1 %1048  ;;  %v1051_v63 = vpop.permute.xlu0 %1050 }
 0x21a   : > { %v1184_v27 = vadd.f32 %v1176_v19, %v1163_v46  ;;  %v1246_v30 = vadd.f32 %v1238_v34, %v1225_v11  ;;  %v1074_v33 = vsel %vm1068_vm1, %v1049_v49, 0.0  ;;  %v1130_v1 = vadd.f32 %v1122_v62, %v1109_v16 }
 0x21b   : > { %v1191_v39 = vadd.f32 %v1183_v9, %v1128_v47  ;;  %v3050_v60 = vadd.f32 %v1245_v51, %v1190_v25  ;;  %v1123_v42 = vmul.f32 %v2943_v35, %v1074_v33  ;;  %v1177_v29 = vmul.f32 %v2947_v13, %v1074_v33 }
 0x21c   : > { %v1192_v36 = vadd.f32 %v1184_v27, %v1129_v50  ;;  %v1239_v26 = vmul.f32 %v2949_v14, %v1074_v33  ;;  %v1075_v28 = vsel %vm1068_vm1, %v1051_v63, 0.0 }
 0x21d   : > { %v3056_v7 = vadd.f32 %v1246_v30, %v1191_v39  ;;  %v1131_v48 = vadd.f32 %v1123_v42, %v1110_v52  ;;  %v1185_v46 = vadd.f32 %v1177_v29, %v1164_v43  ;;  %v1124_v11 = vmul.f32 %v2943_v35, %v1075_v28  ;;  %v1053_v21 = vpop.permute.xlu1 %1052  ;;  %v1055_v2 = vpop.permute.xlu0 %1054 }
 0x21e   : > { %v1247_v37 = vadd.f32 %v1239_v26, %v1226_v31  ;;  %v1178_v45 = vmul.f32 %v2947_v13, %v1075_v28  ;;  %v1240_v38 = vmul.f32 %v2949_v14, %v1075_v28  ;;  %v1076_v16 = vsel %vm1068_vm1, %v1053_v21, 0.0 }
 0x21f   : > { %v1193_v20 = vadd.f32 %v1185_v46, %v1130_v1  ;;  %v1125_v25 = vmul.f32 %v2943_v35, %v1076_v16  ;;  %v1179_v23 = vmul.f32 %v2947_v13, %v1076_v16  ;;  %v1241_v41 = vmul.f32 %v2949_v14, %v1076_v16 }
 0x220   : > { %v1255_v52 = vadd.f32 %v1247_v37, %v1192_v36  ;;  %v1186_v43 = vadd.f32 %v1178_v45, %v1165_v44  ;;  %v1248_v6 = vadd.f32 %v1240_v38, %v1227_v54  ;;  %v1132_v62 = vadd.f32 %v1124_v11, %v1111_v59 }
 0x221   : > { %v1133_v31 = vadd.f32 %v1125_v25, %v1112_v55  ;;  %v1187_v19 = vadd.f32 %v1179_v23, %v1166_v4  ;;  %v1077_v34 = vsel %vm1068_vm1, %v1055_v2, 0.0  ;;  %v1016_v47 = vpop.permute.xlu1 %1015  ;;  %v998_v50 = vpop.permute.xlu0 %997  ;;  %v1249_v8 = vadd.f32 %v1241_v41, %v1228_v58 }
 0x222   : > { %v1194_v9 = vadd.f32 %v1186_v43, %v1131_v48  ;;  %v1256_v51 = vadd.f32 %v1248_v6, %v1193_v20  ;;  %v1180_v56 = vmul.f32 %v2947_v13, %v1077_v34  ;;  %v1242_v63 = vmul.f32 %v2949_v14, %v1077_v34 }
 0x223   : > { %v1195_v49 = vadd.f32 %v1187_v19, %v1132_v62  ;;  %v1037_v44 = vsel %vm1027_vm0, 0.0, %v1016_v47  ;;  %v1028_v54 = vsel %vm1027_vm0, 0.0, %v998_v50  ;;  %v1215_v30 = vmul.f32 %v2951_v40, %v2818_v61 }
 0x224   : > { %v1257_v27 = vadd.f32 %v1249_v8, %v1194_v9  ;;  %v1188_v59 = vadd.f32 %v1180_v56, %v1167_v24  ;;  %v1209_v55 = vmul.f32 %v2945_v12, %v1037_v44  ;;  %v1084_v4 = vmul.f32 %v2937_v5, %v1028_v54 }
 0x225   : > { %v1250_v33 = vadd.f32 %v1242_v63, %v1229_v15  ;;  %v1222_v58 = vmul.f32 %v2951_v40, %v2924_v3  ;;  %v1097_v39 = vmul.f32 %v2941_v10, %v2926_v53  ;;  %v1057_v42 = vpop.permute.xlu1 %1056  ;;  %v1039_v29 = vpop.permute.xlu0 %1038  ;;  %v1202_v1 = vmul.f32 %v2945_v12, %v2969_v17 }
 0x226   : > { %v1173_v24 = vmul.f32 %v2947_v13, %v3026_v22  ;;  %v1196_v36 = vadd.f32 %v1188_v59, %v1133_v31  ;;  %v1078_v5 = vsel %vm1068_vm1, %v1057_v42, 0.0  ;;  %v1069_v3 = vsel %vm1068_vm1, %v1039_v29, 0.0 }
 0x227   : > { %v1258_v26 = vadd.f32 %v1250_v33, %v1195_v49  ;;  %v1230_v61 = vadd.f32 %v1222_v58, %v1209_v55  ;;  %v1243_v28 = vmul.f32 %v2949_v14, %v1078_v5  ;;  %v1160_v53 = vadd.f32 %v2956_v18, %v3009_v0 }
 0x228   : > { %v1236_v10 = vmul.f32 %v2949_v14, %v3029_v32  ;;  %v1105_v40 = vadd.f32 %v1097_v39, %v1084_v4  ;;  %v1118_v12 = vmul.f32 %v2943_v35, %v1069_v3  ;;  %v1223_v13 = vadd.f32 %v1215_v30, %v1202_v1  ;;  %v3312_v30 = vld [vmem:[#allocation28_spill] sm:$0xff]  ;;  %v3313_v39 = vld [vmem:[#allocation30_spill] sm:$0xff]  ;;  %v3315_v1 = vld [vmem:[#allocation29_spill] sm:$0xff] }
 0x229   : > { %v1251_v17 = vadd.f32 %v1243_v28, %v1230_v61  ;;  %v1181_v22 = vadd.f32 %v1173_v24, %v1160_v53  ;;  %v3318_v61 = vld [vmem:[#allocation31_spill] sm:$0xff]  ;;  %v3319_v53 = vld [vmem:[#allocation34_spill] sm:$0xff] }
 0x22a   : > { %v1126_v48 = vadd.f32 %v1118_v12, %v1105_v40  ;;  %v1244_v11 = vadd.f32 %v1236_v10, %v1223_v13  ;;  %v3320_v40 = vld [vmem:[#allocation33_spill] sm:$0xff] }
 0x22b   : > { %v1259_v46 = vadd.f32 %v1251_v17, %v1196_v36 }
 0x22c   : > { %v1189_v21 = vadd.f32 %v1181_v22, %v1126_v48 }
 0x22e   : > { %v1252_v2 = vadd.f32 %v1244_v11, %v1189_v21 }
 0x236   : > { %v1263_v37 = vpop.permute.xlu0 %1262 }
 0x237   : > { %v1265_v45 = vadd.f32 %v1263_v37, %v1252_v2  ;;  %v1266_v38 = vadd.f32 %v1263_v37, %v3050_v60  ;;  %v1267_v18 = vadd.f32 %v1263_v37, %v3056_v7  ;;  %v1268_v0 = vadd.f32 %v1263_v37, %v1255_v52 }
 0x238   : > { %v1269_v16 = vadd.f32 %v1263_v37, %v1256_v51  ;;  %v1270_v14 = vadd.f32 %v1263_v37, %v1257_v27  ;;  %v1271_v32 = vadd.f32 %v1263_v37, %v1258_v26  ;;  %v1272_v25 = vadd.f32 %v1263_v37, %v1259_v46 }
 0x239   : > { %v1615_v15 = vmul.f32 -1.442695, %v1265_v45  ;;  %v1616_v35 = vmul.f32 -1.442695, %v1266_v38  ;;  %v1617_v20 = vmul.f32 -1.442695, %v1267_v18 }
 0x23a   : > { %v1618_v23 = vmul.f32 -1.442695, %v1268_v0  ;;  %v1619_v43 = vmul.f32 -1.442695, %v1269_v16  ;;  %v1620_v6 = vmul.f32 -1.442695, %v1270_v14 }
 0x23b   : > { %1784 = vpow2.f32 %v1615_v15  ;;  %v1621_v41 = vmul.f32 -1.442695, %v1271_v32  ;;  %v1622_v62 = vmul.f32 -1.442695, %v1272_v25 }
 0x23c   : > { %1786 = vpow2.f32 %v1616_v35 }
 0x23d   : > { %1788 = vpow2.f32 %v1617_v20 }
 0x23e   : > { %1790 = vpow2.f32 %v1618_v23 }
 0x23f   : > { %1792 = vpow2.f32 %v1619_v43 }
 0x240   : > { %1794 = vpow2.f32 %v1620_v6 }
 0x241   : > { %1796 = vpow2.f32 %v1621_v41 }
 0x242   : > { %1798 = vpow2.f32 %v1622_v62 }
 0x245   : > { %v1785_v60 = vpop.eup %1784 }
 0x246   : > { %v1787_v7 = vpop.eup %1786  ;;  %v1297_v52 = vadd.f32 1.0, %v1785_v60 }
 0x247   : > { %v1789_v31 = vpop.eup %1788  ;;  %v1298_v19 = vadd.f32 1.0, %v1787_v7 }
 0x248   : > { %v1791_v34 = vpop.eup %1790  ;;  %v1299_v47 = vadd.f32 1.0, %v1789_v31  ;;  %1800 = vrcp.f32 %v1297_v52 }
 0x249   : > { %v1793_v50 = vpop.eup %1792  ;;  %v1300_v9 = vadd.f32 1.0, %v1791_v34  ;;  %1802 = vrcp.f32 %v1298_v19 }
 0x24a   : > { %v1795_v51 = vpop.eup %1794  ;;  %v1301_v8 = vadd.f32 1.0, %v1793_v50  ;;  %1804 = vrcp.f32 %v1299_v47 }
 0x24b   : > { %v1797_v56 = vpop.eup %1796  ;;  %v1302_v49 = vadd.f32 1.0, %v1795_v51  ;;  %1806 = vrcp.f32 %v1300_v9 }
 0x24c   : > { %v1799_v63 = vpop.eup %1798  ;;  %v1303_v44 = vadd.f32 1.0, %v1797_v56  ;;  %1808 = vrcp.f32 %v1301_v8 }
 0x24d   : > { %v1304_v54 = vadd.f32 1.0, %v1799_v63  ;;  %1810 = vrcp.f32 %v1302_v49 }
 0x24e   : > { %1812 = vrcp.f32 %v1303_v44 }
 0x24f   : > { %1814 = vrcp.f32 %v1304_v54 }
 0x252   : > { %v1801_v27 = vpop.eup %1800 }
 0x253   : > { %v1803_v59 = vpop.eup %1802  ;;  %v1321_v55 = vadd.f32 %v1801_v27, %v2806_v57  ;;  %v3316_v57 = vld [vmem:[#allocation32_spill] sm:$0xff] }
 0x254   : > { %v1805_v4 = vpop.eup %1804  ;;  %v1322_v33 = vadd.f32 %v1803_v59, %v3312_v30 }
 0x255   : > { %v1807_v58 = vpop.eup %1806  ;;  %v1323_v42 = vadd.f32 %v1805_v4, %v3313_v39  ;;  %1330 = vst.msk [vmem:[%s627_s13] sm:$0xff] %vm1329_vm2, %v1321_v55 }
 0x256   : > { %v1809_v29 = vpop.eup %1808  ;;  %v1324_v24 = vadd.f32 %v1807_v58, %v3315_v1  ;;  %1331 = vst.msk [vmem:[%s627_s13 + $0x8] sm:$0xff] %vm1329_vm2, %v1322_v33 }
 0x257   : > { %v1811_v36 = vpop.eup %1810  ;;  %v1325_v5 = vadd.f32 %v1809_v29, %v3316_v57  ;;  %1332 = vst.msk [vmem:[%s627_s13 + $0x10] sm:$0xff] %vm1329_vm2, %v1323_v42 }
 0x258   : > { %v1813_v26 = vpop.eup %1812  ;;  %v1326_v28 = vadd.f32 %v1811_v36, %v3318_v61  ;;  %1333 = vst.msk [vmem:[%s627_s13 + $0x18] sm:$0xff] %vm1329_vm2, %v1324_v24 }
 0x259   : > { %v1815_v3 = vpop.eup %1814  ;;  %v1327_v10 = vadd.f32 %v1813_v26, %v3319_v53  ;;  %1334 = vst.msk [vmem:[%s627_s13 + $0x20] sm:$0xff] %vm1329_vm2, %v1325_v5 }
 0x25a   : > { %v1328_v12 = vadd.f32 %v1815_v3, %v3320_v40  ;;  %1335 = vst.msk [vmem:[%s627_s13 + $0x28] sm:$0xff] %vm1329_vm2, %v1326_v28 }
 0x25b   : > { %1336 = vst.msk [vmem:[%s627_s13 + $0x30] sm:$0xff] %vm1329_vm2, %v1327_v10 }
 0x25c   : > { %1337 = vst.msk [vmem:[%s627_s13 + $0x38] sm:$0xff] %vm1329_vm2, %v1328_v12 }
 0x25d   : > { %1979 = shalt.err (!%p1976_p6)
}
 0x25e   : > { %s1980_s25 = scalar_lea.hbm %s3108_s27, 1024  ;;  %s1984_s23 = scalar_lea.hbm %s3317_s8, 4096 }
 0x25f   : > { %p1981_p9 = scmp.ne.s32.totalorder %s3108_s27, %s1980_s25  ;;  %p1985_p12 = scmp.lt.u32.totalorder %s3108_s27, %s3317_s8 }
 0x260   : > { %p1986_p3 = scmp.lt.u32.totalorder %s1984_s23, %s1980_s25  ;;  %p1988_p13 = scmp.lt.u32.totalorder %s1980_s25, %s3108_s27 }
 0x261   : > { %p1982_p10 = pnand %p1981_p9, %p3321_p2 }
 0x262   : > { %p1987_p11 = por %p1986_p3, %p1985_p12 }
 0x263   : > { %p1983_p5 = pneg %p1982_p10 }
 0x264   : > { %p1989_p7 = por %p1988_p13, %p1987_p11 }
 0x266   : > { %p1990_p0 = pnand %p1989_p7, %p1983_p5 }
 0x268   : > { %1993 = shalt.err (!%p1990_p0)
}
 0x269   : > { %s2141_s6 = smov 128   ;;  %s2142_s13 = smov 8  }
 0x26a   : > { %1639 = dma.vmem_to_hbm [thread:$0]  (%p3321_p2), %s3114_s4, 1024, %s3108_s27, %s1339_s11, %s2141_s6, %s2141_s6, %s2142_s13  }
 0x26b PF: > { %p1662_p4 = scmp.ge.s32.totalorder %s2128_s26, 2  ;;  %s1369_s1 = sand.u32 1, %s2100_s19  }
 0x26c   : > { %p3322_p8 = scmp.ne.s32.totalorder %s3274_s24, 0  ;;  %s1370_s22 = scalar_lea.sflag [#allocation4], %s1369_s1 }
 0x26e   : > { %p1658_p1 = pnand %p1662_p4, %p3322_p8 }
 0x270   : > { %2071 = dma.done.wait (!%p1658_p1), %s1370_s22, 1024  }
 0x271   : > { %2073 = vsyncadd (!%p1658_p1), %s1370_s22, 4294966272  ;;  %s32_s26 = sadd.s32 1, %s2128_s26   ;;  %s3324_s16 = sld [smem:[#allocation18_spill]] }
 0x272   : > { %p3149_p6 = scmp.ge.s32.totalorder %s32_s26, 6   ;;  %s3325_s7 = sld [smem:[#allocation27_spill]] }
 0x273   : > { %s3326_s22 = sld [smem:[#allocation21_spill]]  ;;  %s3327_s23 = sld [smem:[#allocation22_spill]] }
 0x274   : > { %s3328_s24 = sld [smem:[#allocation23_spill]]  ;;  %s3329_s25 = sld [smem:[#allocation24_spill]] }
 0x275   : > { %s3330_s13 = smov %s2080_s14  ;;  %s3331_s14 = smov %s2084_s15 }
 0x276   : > { %s3332_s15 = smov %s2512_s9  ;;  %s3333_s17 = smov %s2096_s18 }
 0x277   : > { %s3334_s18 = smov %s2317_s3  ;;  %s3335_s19 = smov %s2104_s20 }
 0x278   : > { %s3336_s20 = smov %s2108_s21  ;;  %s3337_s21 = smov %s3325_s7 }
 0x279   :  { %31 = sbr.rel (!%p3149_p6) target bundleno = 26 (0x1a), region = 167 }
 0x280   :  { %1375 = vsyncpa [#allocation3], 1 }
 0x281   :  { %1377 = vsyncpa [#allocation3 + $0x1], 1 }
 0x282   :  { %1378 = vsyncpa [#allocation6], 1 }
 0x283   :  { %1380 = vsyncpa [#allocation6 + $0x1], 1 }
 0x284   :  { %1381 = vsyncpa [#allocation9], 1 }
 0x285   :  { %1383 = vsyncpa [#allocation9 + $0x1], 1 }
 0x286   :  { %1384 = vsyncpa [#allocation4], 1 }
 0x287   :  { %1386 = vsyncpa [#allocation4 + $0x1], 1 }

</bundles_post_ra>
